<compile_context>
chip_gen: v5e
topology: v5e:2x2
jax: 0.10.0
libtpu: 0.0.40
codegen_flags: <defaults>
</compile_context>

<pallas_src>
import math

import jax
import jax.numpy as jnp
from jax import lax
from jax.experimental import pallas as pl
from jax.experimental.pallas import tpu as pltpu


# ----------------------------------------------------------------------------
# Fused bidirectional LSTM recurrence kernel (one launch per layer).
#   len_ref  : (B, 1) int32   per-sample valid lengths (resident in VMEM)
#   gx_ref   : (T, B, 8H) f32 precomputed x @ [W_ih_f | W_ih_b] + b, all t
#   whh_f/b  : (H, 4H)   f32  recurrent weights per direction
#   hf_ref   : (T, B, H) f32  forward-direction outputs (exactly 0 at pads)
#   hb_ref   : (T, B, H) f32  backward-direction outputs (exactly 0 at pads)
# ----------------------------------------------------------------------------
def _bilstm_rec_kernel(len_ref, gx_ref, whh_f_ref, whh_b_ref, hf_ref, hb_ref):
    T, B, _ = gx_ref.shape
    H = whh_f_ref.shape[0]

    lengths = len_ref[...]                     # (B, 1) int32, loaded once
    w_f = whh_f_ref[...]                       # (H, 4H)
    w_b = whh_b_ref[...]                       # (H, 4H)

    def cell(gates, c_prev):
        # PyTorch gate order i, f, g, o.  (For production sizes pick H as a
        # multiple of 128 so these slices stay lane-aligned.)
        i_g = jax.nn.sigmoid(gates[:, 0:H])
        f_g = jax.nn.sigmoid(gates[:, H:2 * H])
        g_g = jnp.tanh(gates[:, 2 * H:3 * H])
        o_g = jax.nn.sigmoid(gates[:, 3 * H:4 * H])
        c_new = f_g * c_prev + i_g * g_g
        h_new = o_g * jnp.tanh(c_new)
        return h_new, c_new

    def step(s, carry):
        h_f, c_f, h_b, c_b = carry
        t_b = T - 1 - s                        # backward direction: reversed index
                                               # in-kernel -> no jnp.flip in HBM.
        row_f = gx_ref[s]                      # (B, 8H)
        row_b = gx_ref[t_b]                    # (B, 8H)

        gates_f = row_f[:, 0:4 * H] + jnp.dot(
            h_f, w_f, preferred_element_type=jnp.float32)
        gates_b = row_b[:, 4 * H:8 * H] + jnp.dot(
            h_b, w_b, preferred_element_type=jnp.float32)

        hf_new, cf_new = cell(gates_f, c_f)
        hb_new, cb_new = cell(gates_b, c_b)

        valid_f = s < lengths                  # (B, 1) bool, built in-kernel
        valid_b = t_b < lengths

        # Packed-sequence semantics: state frozen and output exactly 0 at pads
        # (the reverse direction therefore starts at t = len-1 per sample).
        h_f = jnp.where(valid_f, hf_new, h_f)
        c_f = jnp.where(valid_f, cf_new, c_f)
        h_b = jnp.where(valid_b, hb_new, h_b)
        c_b = jnp.where(valid_b, cb_new, c_b)

        hf_ref[s] = jnp.where(valid_f, hf_new, 0.0)
        hb_ref[t_b] = jnp.where(valid_b, hb_new, 0.0)
        return h_f, c_f, h_b, c_b

    z = jnp.zeros((B, H), jnp.float32)
    lax.fori_loop(0, T, step, (z, z, z, z), unroll=True)


def _run_bilstm_layer(len_b1, gx, w_hh_f, w_hh_b, hidden):
    T, B, G = gx.shape
    out_sds = jax.ShapeDtypeStruct((T, B, hidden), jnp.float32)
    out_spec = pl.BlockSpec((T, B, hidden), lambda i: (0, 0, 0))
    # Whole time extent fits VMEM at these sizes; for long T, chunk T across a
    # grid axis and carry h/c in VMEM scratch instead.
    return pl.pallas_call(
        _bilstm_rec_kernel,
        out_shape=(out_sds, out_sds),
        grid=(1,),
        in_specs=[
            pl.BlockSpec((B, 1), lambda i: (0, 0)),
            pl.BlockSpec((T, B, G), lambda i: (0, 0, 0)),
            pl.BlockSpec((hidden, 4 * hidden), lambda i: (0, 0)),
            pl.BlockSpec((hidden, 4 * hidden), lambda i: (0, 0)),
        ],
        out_specs=(out_spec, out_spec),
        compiler_params=pltpu.CompilerParams(
            dimension_semantics=("arbitrary",)),
    )(len_b1, gx, w_hh_f, w_hh_b)


# ----------------------------------------------------------------------------
# Attention pooling kernel: whole batch in one launch (no per-b grid).
#   outs_ref : (B*T, 2H) f32  batch-major flattened bi-LSTM outputs
#   mask_ref : (B*T, 1)  f32  1.0 if valid timestep else 0.0
#   w_ref    : (2H, 2H)  f32  w_omega
#   u_ref    : (1, 2H)   f32  u_omega (transposed for a lane-axis reduction)
#   res_ref  : (B, 2H)   f32
# ----------------------------------------------------------------------------
def _attention_kernel(outs_ref, mask_ref, w_ref, u_ref, res_ref):
    B, _ = res_ref.shape
    BT = outs_ref.shape[0]
    T = BT // B

    outs = outs_ref[...]                                          # (B*T, 2H)
    # One batched (B*T, 2H) @ (2H, 2H) matmul for the whole batch.
    u = jnp.tanh(jnp.dot(outs, w_ref[...],
                         preferred_element_type=jnp.float32))
    # u @ u_omega as a lane-axis reduction instead of a 1-lane MXU result.
    att = jnp.sum(u * u_ref[...], axis=-1, keepdims=True)         # (B*T, 1)
    att = jnp.where(mask_ref[...] > 0.0, att, -10000000000.0)

    for b in range(B):                                            # static, small B
        att_b = att[b * T:(b + 1) * T, :]                         # (T, 1)
        att_b = att_b - jnp.max(att_b, axis=0, keepdims=True)
        e = jnp.exp(att_b)
        # Guarded denominator (degenerate all-masked rows stay finite).
        denom = jnp.maximum(jnp.sum(e, axis=0, keepdims=True), 1e-30)
        score = e * pl.reciprocal(denom, approx=True)             # softmax over T
        pooled = jnp.sum(outs[b * T:(b + 1) * T, :] * score,
                         axis=0, keepdims=True)                   # (1, 2H)
        res_ref[b:b + 1, :] = pooled


def _attention_pool(outs_flat, mask_flat, w_omega, u_omega_row, batch):
    BT, D = outs_flat.shape
    return pl.pallas_call(
        _attention_kernel,
        out_shape=jax.ShapeDtypeStruct((batch, D), jnp.float32),
        grid=(1,),
        in_specs=[
            pl.BlockSpec((BT, D), lambda i: (0, 0)),
            pl.BlockSpec((BT, 1), lambda i: (0, 0)),
            pl.BlockSpec((D, D), lambda i: (0, 0)),
            pl.BlockSpec((1, D), lambda i: (0, 0)),
        ],
        out_specs=pl.BlockSpec((batch, D), lambda i: (0, 0)),
        compiler_params=pltpu.CompilerParams(
            dimension_semantics=("arbitrary",)),
    )(outs_flat, mask_flat, w_omega, u_omega_row)


# ----------------------------------------------------------------------------
# Parameters & forward wrapper
# ----------------------------------------------------------------------------
def init_params(key, embedding_size, hidden_size, num_layers):
    bound = 1.0 / math.sqrt(hidden_size)
    keys = iter(jax.random.split(key, num_layers * 8 + 2))
    layers = []
    d_in = embedding_size
    for _ in range(num_layers):
        per_dir = []
        for _direction in range(2):                    # fwd, bwd
            w_ih = jax.random.uniform(next(keys), (d_in, 4 * hidden_size),
                                      jnp.float32, -bound, bound)
            w_hh = jax.random.uniform(next(keys), (hidden_size, 4 * hidden_size),
                                      jnp.float32, -bound, bound)
            b_ih = jax.random.uniform(next(keys), (1, 4 * hidden_size),
                                      jnp.float32, -bound, bound)
            b_hh = jax.random.uniform(next(keys), (1, 4 * hidden_size),
                                      jnp.float32, -bound, bound)
            per_dir.append((w_ih, w_hh, b_ih + b_hh))
        (wif, whf, bf), (wib, whb, bb) = per_dir
        layers.append({
            # Directions stacked column-wise -> one (d_in, 8H) projection matmul.
            "w_ih": jnp.concatenate([wif, wib], axis=1),
            "b": jnp.concatenate([bf, bb], axis=1),
            "w_hh_f": whf,
            "w_hh_b": whb,
        })
        d_in = 2 * hidden_size
    w_omega = jax.random.uniform(next(keys), (2 * hidden_size, 2 * hidden_size),
                                 jnp.float32, -0.1, 0.1)
    u_omega = jax.random.uniform(next(keys), (2 * hidden_size, 1),
                                 jnp.float32, -0.1, 0.1)
    return {"lstm": layers, "w_omega": w_omega, "u_omega": u_omega}


def _input_projection(h_parts, w_ih, b):
    """Hoisted input projection: one large batched matmul over all timesteps
    and both directions, done in plain XLA (off the serial recurrence)."""
    gx = b
    off = 0
    for part in h_parts:
        d = part.shape[-1]
        gx = gx + jnp.einsum("tbd,dg->tbg", part, w_ih[off:off + d, :])
        off += d
    return gx


def st_lstm_forward(x, lengths, params, hidden_size):
    """x: (B, T, E) float32 padded inputs; lengths: (B,) int32. Returns (B, 2H)."""
    B, T, _ = x.shape
    len_b1 = lengths.astype(jnp.int32).reshape(B, 1)

    # Time-major once for the whole LSTM stack.
    h_parts = [jnp.transpose(x, (1, 0, 2))]               # [(T, B, E)]
    for layer in params["lstm"]:
        gx = _input_projection(h_parts, layer["w_ih"], layer["b"])   # (T, B, 8H)
        h_f, h_b = _run_bilstm_layer(len_b1, gx, layer["w_hh_f"],
                                     layer["w_hh_b"], hidden_size)
        h_parts = [h_f, h_b]                               # fed to next layer unconcatenated
        # nn.LSTM inter-layer dropout is inactive in eval/forward mode.

    # Attention boundary: back to batch-first, flattened (B*T, 2H), once.
    D = 2 * hidden_size
    outs = jnp.concatenate(h_parts, axis=-1)               # (T, B, 2H)
    outs_flat = jnp.transpose(outs, (1, 0, 2)).reshape(B * T, D)
    mask_flat = (jnp.arange(T)[None, :] < lengths[:, None]
                 ).astype(jnp.float32).reshape(B * T, 1)
    return _attention_pool(outs_flat, mask_flat, params["w_omega"],
                           params["u_omega"].reshape(1, D), B)


if __name__ == "__main__":
    B, T, E, H, L = 2, 8, 16, 32, 2
    key = jax.random.PRNGKey(0)
    kx, kp = jax.random.split(key)

    x = jax.random.normal(kx, (B, T, E), dtype=jnp.float32)
    lengths = jnp.array([T, 5], dtype=jnp.int32)           # variable lengths
    params = init_params(kp, E, H, L)

    out = jax.block_until_ready(st_lstm_forward(x, lengths, params, H))

    assert out.shape == (B, 2 * H), out.shape
    assert bool(jnp.all(jnp.isfinite(out)))
    print("KERNEL_OK")
</pallas_src>

<mosaic_0001>
module attributes {stable_mosaic.version = 11 : i64} {
  func.func @_bilstm_rec_kernel(%arg0: i32, %arg1: memref<2x1xi32, #tpu.memory_space<vmem>>, %arg2: memref<8x2x256xf32, #tpu.memory_space<vmem>>, %arg3: memref<32x128xf32, #tpu.memory_space<vmem>>, %arg4: memref<32x128xf32, #tpu.memory_space<vmem>>, %arg5: memref<8x2x32xf32, #tpu.memory_space<vmem>>, %arg6: memref<8x2x32xf32, #tpu.memory_space<vmem>>) attributes {dimension_semantics = [#tpu.dimension_semantics<arbitrary>], iteration_bounds = array<i64: 1>, scalar_prefetch = 0 : i64, scratch_operands = 0 : i64, tpu.core_type = #tpu.core_type<tc>, window_params = [{pipeline_mode = #tpu.pipeline_mode<synchronous>, transform_indices = @transform_0, window_bounds = array<i64: 2, 1>}, {pipeline_mode = #tpu.pipeline_mode<synchronous>, transform_indices = @transform_1, window_bounds = array<i64: 8, 2, 256>}, {pipeline_mode = #tpu.pipeline_mode<synchronous>, transform_indices = @transform_2, window_bounds = array<i64: 32, 128>}, {pipeline_mode = #tpu.pipeline_mode<synchronous>, transform_indices = @transform_3, window_bounds = array<i64: 32, 128>}, {pipeline_mode = #tpu.pipeline_mode<synchronous>, transform_indices = @transform_4, window_bounds = array<i64: 8, 2, 32>}, {pipeline_mode = #tpu.pipeline_mode<synchronous>, transform_indices = @transform_5, window_bounds = array<i64: 8, 2, 32>}]} {
    %c0 = arith.constant 0 : index
    %c0_0 = arith.constant 0 : index
    %0 = vector.load %arg1[%c0, %c0_0] : memref<2x1xi32, #tpu.memory_space<vmem>>, vector<2x1xi32>
    %c0_1 = arith.constant 0 : index
    %c0_2 = arith.constant 0 : index
    %1 = vector.load %arg3[%c0_1, %c0_2] : memref<32x128xf32, #tpu.memory_space<vmem>>, vector<32x128xf32>
    %c0_3 = arith.constant 0 : index
    %c0_4 = arith.constant 0 : index
    %2 = vector.load %arg4[%c0_3, %c0_4] : memref<32x128xf32, #tpu.memory_space<vmem>>, vector<32x128xf32>
    %cst = arith.constant 0.000000e+00 : f32
    %3 = vector.broadcast %cst : f32 to vector<2x32xf32>
    %c0_i32 = arith.constant 0 : i32
    %c7_i32 = arith.constant 7 : i32
    %4 = arith.subi %c7_i32, %c0_i32 : i32
    %5 = arith.index_cast %c0_i32 : i32 to index
    %c0_5 = arith.constant 0 : index
    %c0_6 = arith.constant 0 : index
    %6 = vector.load %arg2[%5, %c0_5, %c0_6] : memref<8x2x256xf32, #tpu.memory_space<vmem>>, vector<1x2x256xf32>
    %7 = vector.shape_cast %6 : vector<1x2x256xf32> to vector<2x256xf32>
    %8 = arith.index_cast %4 : i32 to index
    %c0_7 = arith.constant 0 : index
    %c0_8 = arith.constant 0 : index
    %9 = vector.load %arg2[%8, %c0_7, %c0_8] : memref<8x2x256xf32, #tpu.memory_space<vmem>>, vector<1x2x256xf32>
    %10 = vector.shape_cast %9 : vector<1x2x256xf32> to vector<2x256xf32>
    %11 = vector.extract_strided_slice %7 {offsets = [0, 0], sizes = [2, 128], strides = [1, 1]} : vector<2x256xf32> to vector<2x128xf32>
    %cst_9 = arith.constant dense<0.000000e+00> : vector<2x128xf32>
    %12 = tpu.matmul %3, %1, %cst_9 {dimension_numbers = #tpu.dot_dimension_numbers<[1], [0], [0], [1], [0, 0, 1, 1], [], []>} : vector<2x32xf32>, vector<32x128xf32>, vector<2x128xf32> -> vector<2x128xf32>
    %13 = arith.addf %11, %12 : vector<2x128xf32>
    %14 = vector.extract_strided_slice %10 {offsets = [0, 128], sizes = [2, 128], strides = [1, 1]} : vector<2x256xf32> to vector<2x128xf32>
    %cst_10 = arith.constant dense<0.000000e+00> : vector<2x128xf32>
    %15 = tpu.matmul %3, %2, %cst_10 {dimension_numbers = #tpu.dot_dimension_numbers<[1], [0], [0], [1], [0, 0, 1, 1], [], []>} : vector<2x32xf32>, vector<32x128xf32>, vector<2x128xf32> -> vector<2x128xf32>
    %16 = arith.addf %14, %15 : vector<2x128xf32>
    %17 = vector.extract_strided_slice %13 {offsets = [0, 0], sizes = [2, 32], strides = [1, 1]} : vector<2x128xf32> to vector<2x32xf32>
    %18 = arith.negf %17 : vector<2x32xf32>
    %19 = math.exp %18 : vector<2x32xf32>
    %cst_11 = arith.constant 1.000000e+00 : f32
    %20 = vector.broadcast %cst_11 : f32 to vector<2x32xf32>
    %21 = arith.addf %20, %19 : vector<2x32xf32>
    %22 = arith.divf %20, %21 : vector<2x32xf32>
    %23 = vector.extract_strided_slice %13 {offsets = [0, 32], sizes = [2, 32], strides = [1, 1]} : vector<2x128xf32> to vector<2x32xf32>
    %24 = arith.negf %23 : vector<2x32xf32>
    %25 = math.exp %24 : vector<2x32xf32>
    %cst_12 = arith.constant 1.000000e+00 : f32
    %26 = vector.broadcast %cst_12 : f32 to vector<2x32xf32>
    %27 = arith.addf %26, %25 : vector<2x32xf32>
    %28 = arith.divf %26, %27 : vector<2x32xf32>
    %29 = vector.extract_strided_slice %13 {offsets = [0, 64], sizes = [2, 32], strides = [1, 1]} : vector<2x128xf32> to vector<2x32xf32>
    %30 = math.tanh %29 : vector<2x32xf32>
    %31 = vector.extract_strided_slice %13 {offsets = [0, 96], sizes = [2, 32], strides = [1, 1]} : vector<2x128xf32> to vector<2x32xf32>
    %32 = arith.negf %31 : vector<2x32xf32>
    %33 = math.exp %32 : vector<2x32xf32>
    %cst_13 = arith.constant 1.000000e+00 : f32
    %34 = vector.broadcast %cst_13 : f32 to vector<2x32xf32>
    %35 = arith.addf %34, %33 : vector<2x32xf32>
    %36 = arith.divf %34, %35 : vector<2x32xf32>
    %37 = arith.mulf %28, %3 : vector<2x32xf32>
    %38 = arith.mulf %22, %30 : vector<2x32xf32>
    %39 = arith.addf %37, %38 : vector<2x32xf32>
    %40 = math.tanh %39 : vector<2x32xf32>
    %41 = arith.mulf %36, %40 : vector<2x32xf32>
    %42 = vector.extract_strided_slice %16 {offsets = [0, 0], sizes = [2, 32], strides = [1, 1]} : vector<2x128xf32> to vector<2x32xf32>
    %43 = arith.negf %42 : vector<2x32xf32>
    %44 = math.exp %43 : vector<2x32xf32>
    %cst_14 = arith.constant 1.000000e+00 : f32
    %45 = vector.broadcast %cst_14 : f32 to vector<2x32xf32>
    %46 = arith.addf %45, %44 : vector<2x32xf32>
    %47 = arith.divf %45, %46 : vector<2x32xf32>
    %48 = vector.extract_strided_slice %16 {offsets = [0, 32], sizes = [2, 32], strides = [1, 1]} : vector<2x128xf32> to vector<2x32xf32>
    %49 = arith.negf %48 : vector<2x32xf32>
    %50 = math.exp %49 : vector<2x32xf32>
    %cst_15 = arith.constant 1.000000e+00 : f32
    %51 = vector.broadcast %cst_15 : f32 to vector<2x32xf32>
    %52 = arith.addf %51, %50 : vector<2x32xf32>
    %53 = arith.divf %51, %52 : vector<2x32xf32>
    %54 = vector.extract_strided_slice %16 {offsets = [0, 64], sizes = [2, 32], strides = [1, 1]} : vector<2x128xf32> to vector<2x32xf32>
    %55 = math.tanh %54 : vector<2x32xf32>
    %56 = vector.extract_strided_slice %16 {offsets = [0, 96], sizes = [2, 32], strides = [1, 1]} : vector<2x128xf32> to vector<2x32xf32>
    %57 = arith.negf %56 : vector<2x32xf32>
    %58 = math.exp %57 : vector<2x32xf32>
    %cst_16 = arith.constant 1.000000e+00 : f32
    %59 = vector.broadcast %cst_16 : f32 to vector<2x32xf32>
    %60 = arith.addf %59, %58 : vector<2x32xf32>
    %61 = arith.divf %59, %60 : vector<2x32xf32>
    %62 = arith.mulf %53, %3 : vector<2x32xf32>
    %63 = arith.mulf %47, %55 : vector<2x32xf32>
    %64 = arith.addf %62, %63 : vector<2x32xf32>
    %65 = math.tanh %64 : vector<2x32xf32>
    %66 = arith.mulf %61, %65 : vector<2x32xf32>
    %67 = vector.broadcast %c0_i32 : i32 to vector<2x1xi32>
    %68 = arith.cmpi slt, %67, %0 : vector<2x1xi32>
    %69 = vector.broadcast %4 : i32 to vector<2x1xi32>
    %70 = arith.cmpi slt, %69, %0 : vector<2x1xi32>
    %71 = vector.shape_cast %68 : vector<2x1xi1> to vector<2x1xi1>
    %72 = vector.broadcast %71 : vector<2x1xi1> to vector<2x32xi1>
    %73 = arith.select %72, %41, %3 : vector<2x32xi1>, vector<2x32xf32>
    %74 = vector.shape_cast %68 : vector<2x1xi1> to vector<2x1xi1>
    %75 = vector.broadcast %74 : vector<2x1xi1> to vector<2x32xi1>
    %76 = arith.select %75, %39, %3 : vector<2x32xi1>, vector<2x32xf32>
    %77 = vector.shape_cast %70 : vector<2x1xi1> to vector<2x1xi1>
    %78 = vector.broadcast %77 : vector<2x1xi1> to vector<2x32xi1>
    %79 = arith.select %78, %66, %3 : vector<2x32xi1>, vector<2x32xf32>
    %80 = vector.shape_cast %70 : vector<2x1xi1> to vector<2x1xi1>
    %81 = vector.broadcast %80 : vector<2x1xi1> to vector<2x32xi1>
    %82 = arith.select %81, %64, %3 : vector<2x32xi1>, vector<2x32xf32>
    %cst_17 = arith.constant 0.000000e+00 : f32
    %83 = vector.shape_cast %68 : vector<2x1xi1> to vector<2x1xi1>
    %84 = vector.broadcast %83 : vector<2x1xi1> to vector<2x32xi1>
    %85 = vector.broadcast %cst_17 : f32 to vector<2x32xf32>
    %86 = arith.select %84, %41, %85 : vector<2x32xi1>, vector<2x32xf32>
    %87 = arith.index_cast %c0_i32 : i32 to index
    %c0_18 = arith.constant 0 : index
    %c0_19 = arith.constant 0 : index
    %88 = vector.load %arg5[%87, %c0_18, %c0_19] : memref<8x2x32xf32, #tpu.memory_space<vmem>>, vector<1x2x32xf32>
    %89 = vector.shape_cast %88 : vector<1x2x32xf32> to vector<2x32xf32>
    %90 = vector.shape_cast %86 : vector<2x32xf32> to vector<1x2x32xf32>
    tpu.vector_store %arg5[%87, %c0_18, %c0_19], %90 {strides = array<i32>} : memref<8x2x32xf32, #tpu.memory_space<vmem>>, vector<1x2x32xf32>,
    %cst_20 = arith.constant 0.000000e+00 : f32
    %91 = vector.shape_cast %70 : vector<2x1xi1> to vector<2x1xi1>
    %92 = vector.broadcast %91 : vector<2x1xi1> to vector<2x32xi1>
    %93 = vector.broadcast %cst_20 : f32 to vector<2x32xf32>
    %94 = arith.select %92, %66, %93 : vector<2x32xi1>, vector<2x32xf32>
    %95 = arith.index_cast %4 : i32 to index
    %c0_21 = arith.constant 0 : index
    %c0_22 = arith.constant 0 : index
    %96 = vector.load %arg6[%95, %c0_21, %c0_22] : memref<8x2x32xf32, #tpu.memory_space<vmem>>, vector<1x2x32xf32>
    %97 = vector.shape_cast %96 : vector<1x2x32xf32> to vector<2x32xf32>
    %98 = vector.shape_cast %94 : vector<2x32xf32> to vector<1x2x32xf32>
    tpu.vector_store %arg6[%95, %c0_21, %c0_22], %98 {strides = array<i32>} : memref<8x2x32xf32, #tpu.memory_space<vmem>>, vector<1x2x32xf32>,
    %c1_i32 = arith.constant 1 : i32
    %c7_i32_23 = arith.constant 7 : i32
    %99 = arith.subi %c7_i32_23, %c1_i32 : i32
    %100 = arith.index_cast %c1_i32 : i32 to index
    %c0_24 = arith.constant 0 : index
    %c0_25 = arith.constant 0 : index
    %101 = vector.load %arg2[%100, %c0_24, %c0_25] : memref<8x2x256xf32, #tpu.memory_space<vmem>>, vector<1x2x256xf32>
    %102 = vector.shape_cast %101 : vector<1x2x256xf32> to vector<2x256xf32>
    %103 = arith.index_cast %99 : i32 to index
    %c0_26 = arith.constant 0 : index
    %c0_27 = arith.constant 0 : index
    %104 = vector.load %arg2[%103, %c0_26, %c0_27] : memref<8x2x256xf32, #tpu.memory_space<vmem>>, vector<1x2x256xf32>
    %105 = vector.shape_cast %104 : vector<1x2x256xf32> to vector<2x256xf32>
    %106 = vector.extract_strided_slice %102 {offsets = [0, 0], sizes = [2, 128], strides = [1, 1]} : vector<2x256xf32> to vector<2x128xf32>
    %cst_28 = arith.constant dense<0.000000e+00> : vector<2x128xf32>
    %107 = tpu.matmul %73, %1, %cst_28 {dimension_numbers = #tpu.dot_dimension_numbers<[1], [0], [0], [1], [0, 0, 1, 1], [], []>} : vector<2x32xf32>, vector<32x128xf32>, vector<2x128xf32> -> vector<2x128xf32>
    %108 = arith.addf %106, %107 : vector<2x128xf32>
    %109 = vector.extract_strided_slice %105 {offsets = [0, 128], sizes = [2, 128], strides = [1, 1]} : vector<2x256xf32> to vector<2x128xf32>
    %cst_29 = arith.constant dense<0.000000e+00> : vector<2x128xf32>
    %110 = tpu.matmul %79, %2, %cst_29 {dimension_numbers = #tpu.dot_dimension_numbers<[1], [0], [0], [1], [0, 0, 1, 1], [], []>} : vector<2x32xf32>, vector<32x128xf32>, vector<2x128xf32> -> vector<2x128xf32>
    %111 = arith.addf %109, %110 : vector<2x128xf32>
    %112 = vector.extract_strided_slice %108 {offsets = [0, 0], sizes = [2, 32], strides = [1, 1]} : vector<2x128xf32> to vector<2x32xf32>
    %113 = arith.negf %112 : vector<2x32xf32>
    %114 = math.exp %113 : vector<2x32xf32>
    %cst_30 = arith.constant 1.000000e+00 : f32
    %115 = vector.broadcast %cst_30 : f32 to vector<2x32xf32>
    %116 = arith.addf %115, %114 : vector<2x32xf32>
    %117 = arith.divf %115, %116 : vector<2x32xf32>
    %118 = vector.extract_strided_slice %108 {offsets = [0, 32], sizes = [2, 32], strides = [1, 1]} : vector<2x128xf32> to vector<2x32xf32>
    %119 = arith.negf %118 : vector<2x32xf32>
    %120 = math.exp %119 : vector<2x32xf32>
    %cst_31 = arith.constant 1.000000e+00 : f32
    %121 = vector.broadcast %cst_31 : f32 to vector<2x32xf32>
    %122 = arith.addf %121, %120 : vector<2x32xf32>
    %123 = arith.divf %121, %122 : vector<2x32xf32>
    %124 = vector.extract_strided_slice %108 {offsets = [0, 64], sizes = [2, 32], strides = [1, 1]} : vector<2x128xf32> to vector<2x32xf32>
    %125 = math.tanh %124 : vector<2x32xf32>
    %126 = vector.extract_strided_slice %108 {offsets = [0, 96], sizes = [2, 32], strides = [1, 1]} : vector<2x128xf32> to vector<2x32xf32>
    %127 = arith.negf %126 : vector<2x32xf32>
    %128 = math.exp %127 : vector<2x32xf32>
    %cst_32 = arith.constant 1.000000e+00 : f32
    %129 = vector.broadcast %cst_32 : f32 to vector<2x32xf32>
    %130 = arith.addf %129, %128 : vector<2x32xf32>
    %131 = arith.divf %129, %130 : vector<2x32xf32>
    %132 = arith.mulf %123, %76 : vector<2x32xf32>
    %133 = arith.mulf %117, %125 : vector<2x32xf32>
    %134 = arith.addf %132, %133 : vector<2x32xf32>
    %135 = math.tanh %134 : vector<2x32xf32>
    %136 = arith.mulf %131, %135 : vector<2x32xf32>
    %137 = vector.extract_strided_slice %111 {offsets = [0, 0], sizes = [2, 32], strides = [1, 1]} : vector<2x128xf32> to vector<2x32xf32>
    %138 = arith.negf %137 : vector<2x32xf32>
    %139 = math.exp %138 : vector<2x32xf32>
    %cst_33 = arith.constant 1.000000e+00 : f32
    %140 = vector.broadcast %cst_33 : f32 to vector<2x32xf32>
    %141 = arith.addf %140, %139 : vector<2x32xf32>
    %142 = arith.divf %140, %141 : vector<2x32xf32>
    %143 = vector.extract_strided_slice %111 {offsets = [0, 32], sizes = [2, 32], strides = [1, 1]} : vector<2x128xf32> to vector<2x32xf32>
    %144 = arith.negf %143 : vector<2x32xf32>
    %145 = math.exp %144 : vector<2x32xf32>
    %cst_34 = arith.constant 1.000000e+00 : f32
    %146 = vector.broadcast %cst_34 : f32 to vector<2x32xf32>
    %147 = arith.addf %146, %145 : vector<2x32xf32>
    %148 = arith.divf %146, %147 : vector<2x32xf32>
    %149 = vector.extract_strided_slice %111 {offsets = [0, 64], sizes = [2, 32], strides = [1, 1]} : vector<2x128xf32> to vector<2x32xf32>
    %150 = math.tanh %149 : vector<2x32xf32>
    %151 = vector.extract_strided_slice %111 {offsets = [0, 96], sizes = [2, 32], strides = [1, 1]} : vector<2x128xf32> to vector<2x32xf32>
    %152 = arith.negf %151 : vector<2x32xf32>
    %153 = math.exp %152 : vector<2x32xf32>
    %cst_35 = arith.constant 1.000000e+00 : f32
    %154 = vector.broadcast %cst_35 : f32 to vector<2x32xf32>
    %155 = arith.addf %154, %153 : vector<2x32xf32>
    %156 = arith.divf %154, %155 : vector<2x32xf32>
    %157 = arith.mulf %148, %82 : vector<2x32xf32>
    %158 = arith.mulf %142, %150 : vector<2x32xf32>
    %159 = arith.addf %157, %158 : vector<2x32xf32>
    %160 = math.tanh %159 : vector<2x32xf32>
    %161 = arith.mulf %156, %160 : vector<2x32xf32>
    %162 = vector.broadcast %c1_i32 : i32 to vector<2x1xi32>
    %163 = arith.cmpi slt, %162, %0 : vector<2x1xi32>
    %164 = vector.broadcast %99 : i32 to vector<2x1xi32>
    %165 = arith.cmpi slt, %164, %0 : vector<2x1xi32>
    %166 = vector.shape_cast %163 : vector<2x1xi1> to vector<2x1xi1>
    %167 = vector.broadcast %166 : vector<2x1xi1> to vector<2x32xi1>
    %168 = arith.select %167, %136, %73 : vector<2x32xi1>, vector<2x32xf32>
    %169 = vector.shape_cast %163 : vector<2x1xi1> to vector<2x1xi1>
    %170 = vector.broadcast %169 : vector<2x1xi1> to vector<2x32xi1>
    %171 = arith.select %170, %134, %76 : vector<2x32xi1>, vector<2x32xf32>
    %172 = vector.shape_cast %165 : vector<2x1xi1> to vector<2x1xi1>
    %173 = vector.broadcast %172 : vector<2x1xi1> to vector<2x32xi1>
    %174 = arith.select %173, %161, %79 : vector<2x32xi1>, vector<2x32xf32>
    %175 = vector.shape_cast %165 : vector<2x1xi1> to vector<2x1xi1>
    %176 = vector.broadcast %175 : vector<2x1xi1> to vector<2x32xi1>
    %177 = arith.select %176, %159, %82 : vector<2x32xi1>, vector<2x32xf32>
    %cst_36 = arith.constant 0.000000e+00 : f32
    %178 = vector.shape_cast %163 : vector<2x1xi1> to vector<2x1xi1>
    %179 = vector.broadcast %178 : vector<2x1xi1> to vector<2x32xi1>
    %180 = vector.broadcast %cst_36 : f32 to vector<2x32xf32>
    %181 = arith.select %179, %136, %180 : vector<2x32xi1>, vector<2x32xf32>
    %182 = arith.index_cast %c1_i32 : i32 to index
    %c0_37 = arith.constant 0 : index
    %c0_38 = arith.constant 0 : index
    %183 = vector.load %arg5[%182, %c0_37, %c0_38] : memref<8x2x32xf32, #tpu.memory_space<vmem>>, vector<1x2x32xf32>
    %184 = vector.shape_cast %183 : vector<1x2x32xf32> to vector<2x32xf32>
    %185 = vector.shape_cast %181 : vector<2x32xf32> to vector<1x2x32xf32>
    tpu.vector_store %arg5[%182, %c0_37, %c0_38], %185 {strides = array<i32>} : memref<8x2x32xf32, #tpu.memory_space<vmem>>, vector<1x2x32xf32>,
    %cst_39 = arith.constant 0.000000e+00 : f32
    %186 = vector.shape_cast %165 : vector<2x1xi1> to vector<2x1xi1>
    %187 = vector.broadcast %186 : vector<2x1xi1> to vector<2x32xi1>
    %188 = vector.broadcast %cst_39 : f32 to vector<2x32xf32>
    %189 = arith.select %187, %161, %188 : vector<2x32xi1>, vector<2x32xf32>
    %190 = arith.index_cast %99 : i32 to index
    %c0_40 = arith.constant 0 : index
    %c0_41 = arith.constant 0 : index
    %191 = vector.load %arg6[%190, %c0_40, %c0_41] : memref<8x2x32xf32, #tpu.memory_space<vmem>>, vector<1x2x32xf32>
    %192 = vector.shape_cast %191 : vector<1x2x32xf32> to vector<2x32xf32>
    %193 = vector.shape_cast %189 : vector<2x32xf32> to vector<1x2x32xf32>
    tpu.vector_store %arg6[%190, %c0_40, %c0_41], %193 {strides = array<i32>} : memref<8x2x32xf32, #tpu.memory_space<vmem>>, vector<1x2x32xf32>,
    %c2_i32 = arith.constant 2 : i32
    %c7_i32_42 = arith.constant 7 : i32
    %194 = arith.subi %c7_i32_42, %c2_i32 : i32
    %195 = arith.index_cast %c2_i32 : i32 to index
    %c0_43 = arith.constant 0 : index
    %c0_44 = arith.constant 0 : index
    %196 = vector.load %arg2[%195, %c0_43, %c0_44] : memref<8x2x256xf32, #tpu.memory_space<vmem>>, vector<1x2x256xf32>
    %197 = vector.shape_cast %196 : vector<1x2x256xf32> to vector<2x256xf32>
    %198 = arith.index_cast %194 : i32 to index
    %c0_45 = arith.constant 0 : index
    %c0_46 = arith.constant 0 : index
    %199 = vector.load %arg2[%198, %c0_45, %c0_46] : memref<8x2x256xf32, #tpu.memory_space<vmem>>, vector<1x2x256xf32>
    %200 = vector.shape_cast %199 : vector<1x2x256xf32> to vector<2x256xf32>
    %201 = vector.extract_strided_slice %197 {offsets = [0, 0], sizes = [2, 128], strides = [1, 1]} : vector<2x256xf32> to vector<2x128xf32>
    %cst_47 = arith.constant dense<0.000000e+00> : vector<2x128xf32>
    %202 = tpu.matmul %168, %1, %cst_47 {dimension_numbers = #tpu.dot_dimension_numbers<[1], [0], [0], [1], [0, 0, 1, 1], [], []>} : vector<2x32xf32>, vector<32x128xf32>, vector<2x128xf32> -> vector<2x128xf32>
    %203 = arith.addf %201, %202 : vector<2x128xf32>
    %204 = vector.extract_strided_slice %200 {offsets = [0, 128], sizes = [2, 128], strides = [1, 1]} : vector<2x256xf32> to vector<2x128xf32>
    %cst_48 = arith.constant dense<0.000000e+00> : vector<2x128xf32>
    %205 = tpu.matmul %174, %2, %cst_48 {dimension_numbers = #tpu.dot_dimension_numbers<[1], [0], [0], [1], [0, 0, 1, 1], [], []>} : vector<2x32xf32>, vector<32x128xf32>, vector<2x128xf32> -> vector<2x128xf32>
    %206 = arith.addf %204, %205 : vector<2x128xf32>
    %207 = vector.extract_strided_slice %203 {offsets = [0, 0], sizes = [2, 32], strides = [1, 1]} : vector<2x128xf32> to vector<2x32xf32>
    %208 = arith.negf %207 : vector<2x32xf32>
    %209 = math.exp %208 : vector<2x32xf32>
    %cst_49 = arith.constant 1.000000e+00 : f32
    %210 = vector.broadcast %cst_49 : f32 to vector<2x32xf32>
    %211 = arith.addf %210, %209 : vector<2x32xf32>
    %212 = arith.divf %210, %211 : vector<2x32xf32>
    %213 = vector.extract_strided_slice %203 {offsets = [0, 32], sizes = [2, 32], strides = [1, 1]} : vector<2x128xf32> to vector<2x32xf32>
    %214 = arith.negf %213 : vector<2x32xf32>
    %215 = math.exp %214 : vector<2x32xf32>
    %cst_50 = arith.constant 1.000000e+00 : f32
    %216 = vector.broadcast %cst_50 : f32 to vector<2x32xf32>
    %217 = arith.addf %216, %215 : vector<2x32xf32>
    %218 = arith.divf %216, %217 : vector<2x32xf32>
    %219 = vector.extract_strided_slice %203 {offsets = [0, 64], sizes = [2, 32], strides = [1, 1]} : vector<2x128xf32> to vector<2x32xf32>
    %220 = math.tanh %219 : vector<2x32xf32>
    %221 = vector.extract_strided_slice %203 {offsets = [0, 96], sizes = [2, 32], strides = [1, 1]} : vector<2x128xf32> to vector<2x32xf32>
    %222 = arith.negf %221 : vector<2x32xf32>
    %223 = math.exp %222 : vector<2x32xf32>
    %cst_51 = arith.constant 1.000000e+00 : f32
    %224 = vector.broadcast %cst_51 : f32 to vector<2x32xf32>
    %225 = arith.addf %224, %223 : vector<2x32xf32>
    %226 = arith.divf %224, %225 : vector<2x32xf32>
    %227 = arith.mulf %218, %171 : vector<2x32xf32>
    %228 = arith.mulf %212, %220 : vector<2x32xf32>
    %229 = arith.addf %227, %228 : vector<2x32xf32>
    %230 = math.tanh %229 : vector<2x32xf32>
    %231 = arith.mulf %226, %230 : vector<2x32xf32>
    %232 = vector.extract_strided_slice %206 {offsets = [0, 0], sizes = [2, 32], strides = [1, 1]} : vector<2x128xf32> to vector<2x32xf32>
    %233 = arith.negf %232 : vector<2x32xf32>
    %234 = math.exp %233 : vector<2x32xf32>
    %cst_52 = arith.constant 1.000000e+00 : f32
    %235 = vector.broadcast %cst_52 : f32 to vector<2x32xf32>
    %236 = arith.addf %235, %234 : vector<2x32xf32>
    %237 = arith.divf %235, %236 : vector<2x32xf32>
    %238 = vector.extract_strided_slice %206 {offsets = [0, 32], sizes = [2, 32], strides = [1, 1]} : vector<2x128xf32> to vector<2x32xf32>
    %239 = arith.negf %238 : vector<2x32xf32>
    %240 = math.exp %239 : vector<2x32xf32>
    %cst_53 = arith.constant 1.000000e+00 : f32
    %241 = vector.broadcast %cst_53 : f32 to vector<2x32xf32>
    %242 = arith.addf %241, %240 : vector<2x32xf32>
    %243 = arith.divf %241, %242 : vector<2x32xf32>
    %244 = vector.extract_strided_slice %206 {offsets = [0, 64], sizes = [2, 32], strides = [1, 1]} : vector<2x128xf32> to vector<2x32xf32>
    %245 = math.tanh %244 : vector<2x32xf32>
    %246 = vector.extract_strided_slice %206 {offsets = [0, 96], sizes = [2, 32], strides = [1, 1]} : vector<2x128xf32> to vector<2x32xf32>
    %247 = arith.negf %246 : vector<2x32xf32>
    %248 = math.exp %247 : vector<2x32xf32>
    %cst_54 = arith.constant 1.000000e+00 : f32
    %249 = vector.broadcast %cst_54 : f32 to vector<2x32xf32>
    %250 = arith.addf %249, %248 : vector<2x32xf32>
    %251 = arith.divf %249, %250 : vector<2x32xf32>
    %252 = arith.mulf %243, %177 : vector<2x32xf32>
    %253 = arith.mulf %237, %245 : vector<2x32xf32>
    %254 = arith.addf %252, %253 : vector<2x32xf32>
    %255 = math.tanh %254 : vector<2x32xf32>
    %256 = arith.mulf %251, %255 : vector<2x32xf32>
    %257 = vector.broadcast %c2_i32 : i32 to vector<2x1xi32>
    %258 = arith.cmpi slt, %257, %0 : vector<2x1xi32>
    %259 = vector.broadcast %194 : i32 to vector<2x1xi32>
    %260 = arith.cmpi slt, %259, %0 : vector<2x1xi32>
    %261 = vector.shape_cast %258 : vector<2x1xi1> to vector<2x1xi1>
    %262 = vector.broadcast %261 : vector<2x1xi1> to vector<2x32xi1>
    %263 = arith.select %262, %231, %168 : vector<2x32xi1>, vector<2x32xf32>
    %264 = vector.shape_cast %258 : vector<2x1xi1> to vector<2x1xi1>
    %265 = vector.broadcast %264 : vector<2x1xi1> to vector<2x32xi1>
    %266 = arith.select %265, %229, %171 : vector<2x32xi1>, vector<2x32xf32>
    %267 = vector.shape_cast %260 : vector<2x1xi1> to vector<2x1xi1>
    %268 = vector.broadcast %267 : vector<2x1xi1> to vector<2x32xi1>
    %269 = arith.select %268, %256, %174 : vector<2x32xi1>, vector<2x32xf32>
    %270 = vector.shape_cast %260 : vector<2x1xi1> to vector<2x1xi1>
    %271 = vector.broadcast %270 : vector<2x1xi1> to vector<2x32xi1>
    %272 = arith.select %271, %254, %177 : vector<2x32xi1>, vector<2x32xf32>
    %cst_55 = arith.constant 0.000000e+00 : f32
    %273 = vector.shape_cast %258 : vector<2x1xi1> to vector<2x1xi1>
    %274 = vector.broadcast %273 : vector<2x1xi1> to vector<2x32xi1>
    %275 = vector.broadcast %cst_55 : f32 to vector<2x32xf32>
    %276 = arith.select %274, %231, %275 : vector<2x32xi1>, vector<2x32xf32>
    %277 = arith.index_cast %c2_i32 : i32 to index
    %c0_56 = arith.constant 0 : index
    %c0_57 = arith.constant 0 : index
    %278 = vector.load %arg5[%277, %c0_56, %c0_57] : memref<8x2x32xf32, #tpu.memory_space<vmem>>, vector<1x2x32xf32>
    %279 = vector.shape_cast %278 : vector<1x2x32xf32> to vector<2x32xf32>
    %280 = vector.shape_cast %276 : vector<2x32xf32> to vector<1x2x32xf32>
    tpu.vector_store %arg5[%277, %c0_56, %c0_57], %280 {strides = array<i32>} : memref<8x2x32xf32, #tpu.memory_space<vmem>>, vector<1x2x32xf32>,
    %cst_58 = arith.constant 0.000000e+00 : f32
    %281 = vector.shape_cast %260 : vector<2x1xi1> to vector<2x1xi1>
    %282 = vector.broadcast %281 : vector<2x1xi1> to vector<2x32xi1>
    %283 = vector.broadcast %cst_58 : f32 to vector<2x32xf32>
    %284 = arith.select %282, %256, %283 : vector<2x32xi1>, vector<2x32xf32>
    %285 = arith.index_cast %194 : i32 to index
    %c0_59 = arith.constant 0 : index
    %c0_60 = arith.constant 0 : index
    %286 = vector.load %arg6[%285, %c0_59, %c0_60] : memref<8x2x32xf32, #tpu.memory_space<vmem>>, vector<1x2x32xf32>
    %287 = vector.shape_cast %286 : vector<1x2x32xf32> to vector<2x32xf32>
    %288 = vector.shape_cast %284 : vector<2x32xf32> to vector<1x2x32xf32>
    tpu.vector_store %arg6[%285, %c0_59, %c0_60], %288 {strides = array<i32>} : memref<8x2x32xf32, #tpu.memory_space<vmem>>, vector<1x2x32xf32>,
    %c3_i32 = arith.constant 3 : i32
    %c7_i32_61 = arith.constant 7 : i32
    %289 = arith.subi %c7_i32_61, %c3_i32 : i32
    %290 = arith.index_cast %c3_i32 : i32 to index
    %c0_62 = arith.constant 0 : index
    %c0_63 = arith.constant 0 : index
    %291 = vector.load %arg2[%290, %c0_62, %c0_63] : memref<8x2x256xf32, #tpu.memory_space<vmem>>, vector<1x2x256xf32>
    %292 = vector.shape_cast %291 : vector<1x2x256xf32> to vector<2x256xf32>
    %293 = arith.index_cast %289 : i32 to index
    %c0_64 = arith.constant 0 : index
    %c0_65 = arith.constant 0 : index
    %294 = vector.load %arg2[%293, %c0_64, %c0_65] : memref<8x2x256xf32, #tpu.memory_space<vmem>>, vector<1x2x256xf32>
    %295 = vector.shape_cast %294 : vector<1x2x256xf32> to vector<2x256xf32>
    %296 = vector.extract_strided_slice %292 {offsets = [0, 0], sizes = [2, 128], strides = [1, 1]} : vector<2x256xf32> to vector<2x128xf32>
    %cst_66 = arith.constant dense<0.000000e+00> : vector<2x128xf32>
    %297 = tpu.matmul %263, %1, %cst_66 {dimension_numbers = #tpu.dot_dimension_numbers<[1], [0], [0], [1], [0, 0, 1, 1], [], []>} : vector<2x32xf32>, vector<32x128xf32>, vector<2x128xf32> -> vector<2x128xf32>
    %298 = arith.addf %296, %297 : vector<2x128xf32>
    %299 = vector.extract_strided_slice %295 {offsets = [0, 128], sizes = [2, 128], strides = [1, 1]} : vector<2x256xf32> to vector<2x128xf32>
    %cst_67 = arith.constant dense<0.000000e+00> : vector<2x128xf32>
    %300 = tpu.matmul %269, %2, %cst_67 {dimension_numbers = #tpu.dot_dimension_numbers<[1], [0], [0], [1], [0, 0, 1, 1], [], []>} : vector<2x32xf32>, vector<32x128xf32>, vector<2x128xf32> -> vector<2x128xf32>
    %301 = arith.addf %299, %300 : vector<2x128xf32>
    %302 = vector.extract_strided_slice %298 {offsets = [0, 0], sizes = [2, 32], strides = [1, 1]} : vector<2x128xf32> to vector<2x32xf32>
    %303 = arith.negf %302 : vector<2x32xf32>
    %304 = math.exp %303 : vector<2x32xf32>
    %cst_68 = arith.constant 1.000000e+00 : f32
    %305 = vector.broadcast %cst_68 : f32 to vector<2x32xf32>
    %306 = arith.addf %305, %304 : vector<2x32xf32>
    %307 = arith.divf %305, %306 : vector<2x32xf32>
    %308 = vector.extract_strided_slice %298 {offsets = [0, 32], sizes = [2, 32], strides = [1, 1]} : vector<2x128xf32> to vector<2x32xf32>
    %309 = arith.negf %308 : vector<2x32xf32>
    %310 = math.exp %309 : vector<2x32xf32>
    %cst_69 = arith.constant 1.000000e+00 : f32
    %311 = vector.broadcast %cst_69 : f32 to vector<2x32xf32>
    %312 = arith.addf %311, %310 : vector<2x32xf32>
    %313 = arith.divf %311, %312 : vector<2x32xf32>
    %314 = vector.extract_strided_slice %298 {offsets = [0, 64], sizes = [2, 32], strides = [1, 1]} : vector<2x128xf32> to vector<2x32xf32>
    %315 = math.tanh %314 : vector<2x32xf32>
    %316 = vector.extract_strided_slice %298 {offsets = [0, 96], sizes = [2, 32], strides = [1, 1]} : vector<2x128xf32> to vector<2x32xf32>
    %317 = arith.negf %316 : vector<2x32xf32>
    %318 = math.exp %317 : vector<2x32xf32>
    %cst_70 = arith.constant 1.000000e+00 : f32
    %319 = vector.broadcast %cst_70 : f32 to vector<2x32xf32>
    %320 = arith.addf %319, %318 : vector<2x32xf32>
    %321 = arith.divf %319, %320 : vector<2x32xf32>
    %322 = arith.mulf %313, %266 : vector<2x32xf32>
    %323 = arith.mulf %307, %315 : vector<2x32xf32>
    %324 = arith.addf %322, %323 : vector<2x32xf32>
    %325 = math.tanh %324 : vector<2x32xf32>
    %326 = arith.mulf %321, %325 : vector<2x32xf32>
    %327 = vector.extract_strided_slice %301 {offsets = [0, 0], sizes = [2, 32], strides = [1, 1]} : vector<2x128xf32> to vector<2x32xf32>
    %328 = arith.negf %327 : vector<2x32xf32>
    %329 = math.exp %328 : vector<2x32xf32>
    %cst_71 = arith.constant 1.000000e+00 : f32
    %330 = vector.broadcast %cst_71 : f32 to vector<2x32xf32>
    %331 = arith.addf %330, %329 : vector<2x32xf32>
    %332 = arith.divf %330, %331 : vector<2x32xf32>
    %333 = vector.extract_strided_slice %301 {offsets = [0, 32], sizes = [2, 32], strides = [1, 1]} : vector<2x128xf32> to vector<2x32xf32>
    %334 = arith.negf %333 : vector<2x32xf32>
    %335 = math.exp %334 : vector<2x32xf32>
    %cst_72 = arith.constant 1.000000e+00 : f32
    %336 = vector.broadcast %cst_72 : f32 to vector<2x32xf32>
    %337 = arith.addf %336, %335 : vector<2x32xf32>
    %338 = arith.divf %336, %337 : vector<2x32xf32>
    %339 = vector.extract_strided_slice %301 {offsets = [0, 64], sizes = [2, 32], strides = [1, 1]} : vector<2x128xf32> to vector<2x32xf32>
    %340 = math.tanh %339 : vector<2x32xf32>
    %341 = vector.extract_strided_slice %301 {offsets = [0, 96], sizes = [2, 32], strides = [1, 1]} : vector<2x128xf32> to vector<2x32xf32>
    %342 = arith.negf %341 : vector<2x32xf32>
    %343 = math.exp %342 : vector<2x32xf32>
    %cst_73 = arith.constant 1.000000e+00 : f32
    %344 = vector.broadcast %cst_73 : f32 to vector<2x32xf32>
    %345 = arith.addf %344, %343 : vector<2x32xf32>
    %346 = arith.divf %344, %345 : vector<2x32xf32>
    %347 = arith.mulf %338, %272 : vector<2x32xf32>
    %348 = arith.mulf %332, %340 : vector<2x32xf32>
    %349 = arith.addf %347, %348 : vector<2x32xf32>
    %350 = math.tanh %349 : vector<2x32xf32>
    %351 = arith.mulf %346, %350 : vector<2x32xf32>
    %352 = vector.broadcast %c3_i32 : i32 to vector<2x1xi32>
    %353 = arith.cmpi slt, %352, %0 : vector<2x1xi32>
    %354 = vector.broadcast %289 : i32 to vector<2x1xi32>
    %355 = arith.cmpi slt, %354, %0 : vector<2x1xi32>
    %356 = vector.shape_cast %353 : vector<2x1xi1> to vector<2x1xi1>
    %357 = vector.broadcast %356 : vector<2x1xi1> to vector<2x32xi1>
    %358 = arith.select %357, %326, %263 : vector<2x32xi1>, vector<2x32xf32>
    %359 = vector.shape_cast %353 : vector<2x1xi1> to vector<2x1xi1>
    %360 = vector.broadcast %359 : vector<2x1xi1> to vector<2x32xi1>
    %361 = arith.select %360, %324, %266 : vector<2x32xi1>, vector<2x32xf32>
    %362 = vector.shape_cast %355 : vector<2x1xi1> to vector<2x1xi1>
    %363 = vector.broadcast %362 : vector<2x1xi1> to vector<2x32xi1>
    %364 = arith.select %363, %351, %269 : vector<2x32xi1>, vector<2x32xf32>
    %365 = vector.shape_cast %355 : vector<2x1xi1> to vector<2x1xi1>
    %366 = vector.broadcast %365 : vector<2x1xi1> to vector<2x32xi1>
    %367 = arith.select %366, %349, %272 : vector<2x32xi1>, vector<2x32xf32>
    %cst_74 = arith.constant 0.000000e+00 : f32
    %368 = vector.shape_cast %353 : vector<2x1xi1> to vector<2x1xi1>
    %369 = vector.broadcast %368 : vector<2x1xi1> to vector<2x32xi1>
    %370 = vector.broadcast %cst_74 : f32 to vector<2x32xf32>
    %371 = arith.select %369, %326, %370 : vector<2x32xi1>, vector<2x32xf32>
    %372 = arith.index_cast %c3_i32 : i32 to index
    %c0_75 = arith.constant 0 : index
    %c0_76 = arith.constant 0 : index
    %373 = vector.load %arg5[%372, %c0_75, %c0_76] : memref<8x2x32xf32, #tpu.memory_space<vmem>>, vector<1x2x32xf32>
    %374 = vector.shape_cast %373 : vector<1x2x32xf32> to vector<2x32xf32>
    %375 = vector.shape_cast %371 : vector<2x32xf32> to vector<1x2x32xf32>
    tpu.vector_store %arg5[%372, %c0_75, %c0_76], %375 {strides = array<i32>} : memref<8x2x32xf32, #tpu.memory_space<vmem>>, vector<1x2x32xf32>,
    %cst_77 = arith.constant 0.000000e+00 : f32
    %376 = vector.shape_cast %355 : vector<2x1xi1> to vector<2x1xi1>
    %377 = vector.broadcast %376 : vector<2x1xi1> to vector<2x32xi1>
    %378 = vector.broadcast %cst_77 : f32 to vector<2x32xf32>
    %379 = arith.select %377, %351, %378 : vector<2x32xi1>, vector<2x32xf32>
    %380 = arith.index_cast %289 : i32 to index
    %c0_78 = arith.constant 0 : index
    %c0_79 = arith.constant 0 : index
    %381 = vector.load %arg6[%380, %c0_78, %c0_79] : memref<8x2x32xf32, #tpu.memory_space<vmem>>, vector<1x2x32xf32>
    %382 = vector.shape_cast %381 : vector<1x2x32xf32> to vector<2x32xf32>
    %383 = vector.shape_cast %379 : vector<2x32xf32> to vector<1x2x32xf32>
    tpu.vector_store %arg6[%380, %c0_78, %c0_79], %383 {strides = array<i32>} : memref<8x2x32xf32, #tpu.memory_space<vmem>>, vector<1x2x32xf32>,
    %c4_i32 = arith.constant 4 : i32
    %c7_i32_80 = arith.constant 7 : i32
    %384 = arith.subi %c7_i32_80, %c4_i32 : i32
    %385 = arith.index_cast %c4_i32 : i32 to index
    %c0_81 = arith.constant 0 : index
    %c0_82 = arith.constant 0 : index
    %386 = vector.load %arg2[%385, %c0_81, %c0_82] : memref<8x2x256xf32, #tpu.memory_space<vmem>>, vector<1x2x256xf32>
    %387 = vector.shape_cast %386 : vector<1x2x256xf32> to vector<2x256xf32>
    %388 = arith.index_cast %384 : i32 to index
    %c0_83 = arith.constant 0 : index
    %c0_84 = arith.constant 0 : index
    %389 = vector.load %arg2[%388, %c0_83, %c0_84] : memref<8x2x256xf32, #tpu.memory_space<vmem>>, vector<1x2x256xf32>
    %390 = vector.shape_cast %389 : vector<1x2x256xf32> to vector<2x256xf32>
    %391 = vector.extract_strided_slice %387 {offsets = [0, 0], sizes = [2, 128], strides = [1, 1]} : vector<2x256xf32> to vector<2x128xf32>
    %cst_85 = arith.constant dense<0.000000e+00> : vector<2x128xf32>
    %392 = tpu.matmul %358, %1, %cst_85 {dimension_numbers = #tpu.dot_dimension_numbers<[1], [0], [0], [1], [0, 0, 1, 1], [], []>} : vector<2x32xf32>, vector<32x128xf32>, vector<2x128xf32> -> vector<2x128xf32>
    %393 = arith.addf %391, %392 : vector<2x128xf32>
    %394 = vector.extract_strided_slice %390 {offsets = [0, 128], sizes = [2, 128], strides = [1, 1]} : vector<2x256xf32> to vector<2x128xf32>
    %cst_86 = arith.constant dense<0.000000e+00> : vector<2x128xf32>
    %395 = tpu.matmul %364, %2, %cst_86 {dimension_numbers = #tpu.dot_dimension_numbers<[1], [0], [0], [1], [0, 0, 1, 1], [], []>} : vector<2x32xf32>, vector<32x128xf32>, vector<2x128xf32> -> vector<2x128xf32>
    %396 = arith.addf %394, %395 : vector<2x128xf32>
    %397 = vector.extract_strided_slice %393 {offsets = [0, 0], sizes = [2, 32], strides = [1, 1]} : vector<2x128xf32> to vector<2x32xf32>
    %398 = arith.negf %397 : vector<2x32xf32>
    %399 = math.exp %398 : vector<2x32xf32>
    %cst_87 = arith.constant 1.000000e+00 : f32
    %400 = vector.broadcast %cst_87 : f32 to vector<2x32xf32>
    %401 = arith.addf %400, %399 : vector<2x32xf32>
    %402 = arith.divf %400, %401 : vector<2x32xf32>
    %403 = vector.extract_strided_slice %393 {offsets = [0, 32], sizes = [2, 32], strides = [1, 1]} : vector<2x128xf32> to vector<2x32xf32>
    %404 = arith.negf %403 : vector<2x32xf32>
    %405 = math.exp %404 : vector<2x32xf32>
    %cst_88 = arith.constant 1.000000e+00 : f32
    %406 = vector.broadcast %cst_88 : f32 to vector<2x32xf32>
    %407 = arith.addf %406, %405 : vector<2x32xf32>
    %408 = arith.divf %406, %407 : vector<2x32xf32>
    %409 = vector.extract_strided_slice %393 {offsets = [0, 64], sizes = [2, 32], strides = [1, 1]} : vector<2x128xf32> to vector<2x32xf32>
    %410 = math.tanh %409 : vector<2x32xf32>
    %411 = vector.extract_strided_slice %393 {offsets = [0, 96], sizes = [2, 32], strides = [1, 1]} : vector<2x128xf32> to vector<2x32xf32>
    %412 = arith.negf %411 : vector<2x32xf32>
    %413 = math.exp %412 : vector<2x32xf32>
    %cst_89 = arith.constant 1.000000e+00 : f32
    %414 = vector.broadcast %cst_89 : f32 to vector<2x32xf32>
    %415 = arith.addf %414, %413 : vector<2x32xf32>
    %416 = arith.divf %414, %415 : vector<2x32xf32>
    %417 = arith.mulf %408, %361 : vector<2x32xf32>
    %418 = arith.mulf %402, %410 : vector<2x32xf32>
    %419 = arith.addf %417, %418 : vector<2x32xf32>
    %420 = math.tanh %419 : vector<2x32xf32>
    %421 = arith.mulf %416, %420 : vector<2x32xf32>
    %422 = vector.extract_strided_slice %396 {offsets = [0, 0], sizes = [2, 32], strides = [1, 1]} : vector<2x128xf32> to vector<2x32xf32>
    %423 = arith.negf %422 : vector<2x32xf32>
    %424 = math.exp %423 : vector<2x32xf32>
    %cst_90 = arith.constant 1.000000e+00 : f32
    %425 = vector.broadcast %cst_90 : f32 to vector<2x32xf32>
    %426 = arith.addf %425, %424 : vector<2x32xf32>
    %427 = arith.divf %425, %426 : vector<2x32xf32>
    %428 = vector.extract_strided_slice %396 {offsets = [0, 32], sizes = [2, 32], strides = [1, 1]} : vector<2x128xf32> to vector<2x32xf32>
    %429 = arith.negf %428 : vector<2x32xf32>
    %430 = math.exp %429 : vector<2x32xf32>
    %cst_91 = arith.constant 1.000000e+00 : f32
    %431 = vector.broadcast %cst_91 : f32 to vector<2x32xf32>
    %432 = arith.addf %431, %430 : vector<2x32xf32>
    %433 = arith.divf %431, %432 : vector<2x32xf32>
    %434 = vector.extract_strided_slice %396 {offsets = [0, 64], sizes = [2, 32], strides = [1, 1]} : vector<2x128xf32> to vector<2x32xf32>
    %435 = math.tanh %434 : vector<2x32xf32>
    %436 = vector.extract_strided_slice %396 {offsets = [0, 96], sizes = [2, 32], strides = [1, 1]} : vector<2x128xf32> to vector<2x32xf32>
    %437 = arith.negf %436 : vector<2x32xf32>
    %438 = math.exp %437 : vector<2x32xf32>
    %cst_92 = arith.constant 1.000000e+00 : f32
    %439 = vector.broadcast %cst_92 : f32 to vector<2x32xf32>
    %440 = arith.addf %439, %438 : vector<2x32xf32>
    %441 = arith.divf %439, %440 : vector<2x32xf32>
    %442 = arith.mulf %433, %367 : vector<2x32xf32>
    %443 = arith.mulf %427, %435 : vector<2x32xf32>
    %444 = arith.addf %442, %443 : vector<2x32xf32>
    %445 = math.tanh %444 : vector<2x32xf32>
    %446 = arith.mulf %441, %445 : vector<2x32xf32>
    %447 = vector.broadcast %c4_i32 : i32 to vector<2x1xi32>
    %448 = arith.cmpi slt, %447, %0 : vector<2x1xi32>
    %449 = vector.broadcast %384 : i32 to vector<2x1xi32>
    %450 = arith.cmpi slt, %449, %0 : vector<2x1xi32>
    %451 = vector.shape_cast %448 : vector<2x1xi1> to vector<2x1xi1>
    %452 = vector.broadcast %451 : vector<2x1xi1> to vector<2x32xi1>
    %453 = arith.select %452, %421, %358 : vector<2x32xi1>, vector<2x32xf32>
    %454 = vector.shape_cast %448 : vector<2x1xi1> to vector<2x1xi1>
    %455 = vector.broadcast %454 : vector<2x1xi1> to vector<2x32xi1>
    %456 = arith.select %455, %419, %361 : vector<2x32xi1>, vector<2x32xf32>
    %457 = vector.shape_cast %450 : vector<2x1xi1> to vector<2x1xi1>
    %458 = vector.broadcast %457 : vector<2x1xi1> to vector<2x32xi1>
    %459 = arith.select %458, %446, %364 : vector<2x32xi1>, vector<2x32xf32>
    %460 = vector.shape_cast %450 : vector<2x1xi1> to vector<2x1xi1>
    %461 = vector.broadcast %460 : vector<2x1xi1> to vector<2x32xi1>
    %462 = arith.select %461, %444, %367 : vector<2x32xi1>, vector<2x32xf32>
    %cst_93 = arith.constant 0.000000e+00 : f32
    %463 = vector.shape_cast %448 : vector<2x1xi1> to vector<2x1xi1>
    %464 = vector.broadcast %463 : vector<2x1xi1> to vector<2x32xi1>
    %465 = vector.broadcast %cst_93 : f32 to vector<2x32xf32>
    %466 = arith.select %464, %421, %465 : vector<2x32xi1>, vector<2x32xf32>
    %467 = arith.index_cast %c4_i32 : i32 to index
    %c0_94 = arith.constant 0 : index
    %c0_95 = arith.constant 0 : index
    %468 = vector.load %arg5[%467, %c0_94, %c0_95] : memref<8x2x32xf32, #tpu.memory_space<vmem>>, vector<1x2x32xf32>
    %469 = vector.shape_cast %468 : vector<1x2x32xf32> to vector<2x32xf32>
    %470 = vector.shape_cast %466 : vector<2x32xf32> to vector<1x2x32xf32>
    tpu.vector_store %arg5[%467, %c0_94, %c0_95], %470 {strides = array<i32>} : memref<8x2x32xf32, #tpu.memory_space<vmem>>, vector<1x2x32xf32>,
    %cst_96 = arith.constant 0.000000e+00 : f32
    %471 = vector.shape_cast %450 : vector<2x1xi1> to vector<2x1xi1>
    %472 = vector.broadcast %471 : vector<2x1xi1> to vector<2x32xi1>
    %473 = vector.broadcast %cst_96 : f32 to vector<2x32xf32>
    %474 = arith.select %472, %446, %473 : vector<2x32xi1>, vector<2x32xf32>
    %475 = arith.index_cast %384 : i32 to index
    %c0_97 = arith.constant 0 : index
    %c0_98 = arith.constant 0 : index
    %476 = vector.load %arg6[%475, %c0_97, %c0_98] : memref<8x2x32xf32, #tpu.memory_space<vmem>>, vector<1x2x32xf32>
    %477 = vector.shape_cast %476 : vector<1x2x32xf32> to vector<2x32xf32>
    %478 = vector.shape_cast %474 : vector<2x32xf32> to vector<1x2x32xf32>
    tpu.vector_store %arg6[%475, %c0_97, %c0_98], %478 {strides = array<i32>} : memref<8x2x32xf32, #tpu.memory_space<vmem>>, vector<1x2x32xf32>,
    %c5_i32 = arith.constant 5 : i32
    %c7_i32_99 = arith.constant 7 : i32
    %479 = arith.subi %c7_i32_99, %c5_i32 : i32
    %480 = arith.index_cast %c5_i32 : i32 to index
    %c0_100 = arith.constant 0 : index
    %c0_101 = arith.constant 0 : index
    %481 = vector.load %arg2[%480, %c0_100, %c0_101] : memref<8x2x256xf32, #tpu.memory_space<vmem>>, vector<1x2x256xf32>
    %482 = vector.shape_cast %481 : vector<1x2x256xf32> to vector<2x256xf32>
    %483 = arith.index_cast %479 : i32 to index
    %c0_102 = arith.constant 0 : index
    %c0_103 = arith.constant 0 : index
    %484 = vector.load %arg2[%483, %c0_102, %c0_103] : memref<8x2x256xf32, #tpu.memory_space<vmem>>, vector<1x2x256xf32>
    %485 = vector.shape_cast %484 : vector<1x2x256xf32> to vector<2x256xf32>
    %486 = vector.extract_strided_slice %482 {offsets = [0, 0], sizes = [2, 128], strides = [1, 1]} : vector<2x256xf32> to vector<2x128xf32>
    %cst_104 = arith.constant dense<0.000000e+00> : vector<2x128xf32>
    %487 = tpu.matmul %453, %1, %cst_104 {dimension_numbers = #tpu.dot_dimension_numbers<[1], [0], [0], [1], [0, 0, 1, 1], [], []>} : vector<2x32xf32>, vector<32x128xf32>, vector<2x128xf32> -> vector<2x128xf32>
    %488 = arith.addf %486, %487 : vector<2x128xf32>
    %489 = vector.extract_strided_slice %485 {offsets = [0, 128], sizes = [2, 128], strides = [1, 1]} : vector<2x256xf32> to vector<2x128xf32>
    %cst_105 = arith.constant dense<0.000000e+00> : vector<2x128xf32>
    %490 = tpu.matmul %459, %2, %cst_105 {dimension_numbers = #tpu.dot_dimension_numbers<[1], [0], [0], [1], [0, 0, 1, 1], [], []>} : vector<2x32xf32>, vector<32x128xf32>, vector<2x128xf32> -> vector<2x128xf32>
    %491 = arith.addf %489, %490 : vector<2x128xf32>
    %492 = vector.extract_strided_slice %488 {offsets = [0, 0], sizes = [2, 32], strides = [1, 1]} : vector<2x128xf32> to vector<2x32xf32>
    %493 = arith.negf %492 : vector<2x32xf32>
    %494 = math.exp %493 : vector<2x32xf32>
    %cst_106 = arith.constant 1.000000e+00 : f32
    %495 = vector.broadcast %cst_106 : f32 to vector<2x32xf32>
    %496 = arith.addf %495, %494 : vector<2x32xf32>
    %497 = arith.divf %495, %496 : vector<2x32xf32>
    %498 = vector.extract_strided_slice %488 {offsets = [0, 32], sizes = [2, 32], strides = [1, 1]} : vector<2x128xf32> to vector<2x32xf32>
    %499 = arith.negf %498 : vector<2x32xf32>
    %500 = math.exp %499 : vector<2x32xf32>
    %cst_107 = arith.constant 1.000000e+00 : f32
    %501 = vector.broadcast %cst_107 : f32 to vector<2x32xf32>
    %502 = arith.addf %501, %500 : vector<2x32xf32>
    %503 = arith.divf %501, %502 : vector<2x32xf32>
    %504 = vector.extract_strided_slice %488 {offsets = [0, 64], sizes = [2, 32], strides = [1, 1]} : vector<2x128xf32> to vector<2x32xf32>
    %505 = math.tanh %504 : vector<2x32xf32>
    %506 = vector.extract_strided_slice %488 {offsets = [0, 96], sizes = [2, 32], strides = [1, 1]} : vector<2x128xf32> to vector<2x32xf32>
    %507 = arith.negf %506 : vector<2x32xf32>
    %508 = math.exp %507 : vector<2x32xf32>
    %cst_108 = arith.constant 1.000000e+00 : f32
    %509 = vector.broadcast %cst_108 : f32 to vector<2x32xf32>
    %510 = arith.addf %509, %508 : vector<2x32xf32>
    %511 = arith.divf %509, %510 : vector<2x32xf32>
    %512 = arith.mulf %503, %456 : vector<2x32xf32>
    %513 = arith.mulf %497, %505 : vector<2x32xf32>
    %514 = arith.addf %512, %513 : vector<2x32xf32>
    %515 = math.tanh %514 : vector<2x32xf32>
    %516 = arith.mulf %511, %515 : vector<2x32xf32>
    %517 = vector.extract_strided_slice %491 {offsets = [0, 0], sizes = [2, 32], strides = [1, 1]} : vector<2x128xf32> to vector<2x32xf32>
    %518 = arith.negf %517 : vector<2x32xf32>
    %519 = math.exp %518 : vector<2x32xf32>
    %cst_109 = arith.constant 1.000000e+00 : f32
    %520 = vector.broadcast %cst_109 : f32 to vector<2x32xf32>
    %521 = arith.addf %520, %519 : vector<2x32xf32>
    %522 = arith.divf %520, %521 : vector<2x32xf32>
    %523 = vector.extract_strided_slice %491 {offsets = [0, 32], sizes = [2, 32], strides = [1, 1]} : vector<2x128xf32> to vector<2x32xf32>
    %524 = arith.negf %523 : vector<2x32xf32>
    %525 = math.exp %524 : vector<2x32xf32>
    %cst_110 = arith.constant 1.000000e+00 : f32
    %526 = vector.broadcast %cst_110 : f32 to vector<2x32xf32>
    %527 = arith.addf %526, %525 : vector<2x32xf32>
    %528 = arith.divf %526, %527 : vector<2x32xf32>
    %529 = vector.extract_strided_slice %491 {offsets = [0, 64], sizes = [2, 32], strides = [1, 1]} : vector<2x128xf32> to vector<2x32xf32>
    %530 = math.tanh %529 : vector<2x32xf32>
    %531 = vector.extract_strided_slice %491 {offsets = [0, 96], sizes = [2, 32], strides = [1, 1]} : vector<2x128xf32> to vector<2x32xf32>
    %532 = arith.negf %531 : vector<2x32xf32>
    %533 = math.exp %532 : vector<2x32xf32>
    %cst_111 = arith.constant 1.000000e+00 : f32
    %534 = vector.broadcast %cst_111 : f32 to vector<2x32xf32>
    %535 = arith.addf %534, %533 : vector<2x32xf32>
    %536 = arith.divf %534, %535 : vector<2x32xf32>
    %537 = arith.mulf %528, %462 : vector<2x32xf32>
    %538 = arith.mulf %522, %530 : vector<2x32xf32>
    %539 = arith.addf %537, %538 : vector<2x32xf32>
    %540 = math.tanh %539 : vector<2x32xf32>
    %541 = arith.mulf %536, %540 : vector<2x32xf32>
    %542 = vector.broadcast %c5_i32 : i32 to vector<2x1xi32>
    %543 = arith.cmpi slt, %542, %0 : vector<2x1xi32>
    %544 = vector.broadcast %479 : i32 to vector<2x1xi32>
    %545 = arith.cmpi slt, %544, %0 : vector<2x1xi32>
    %546 = vector.shape_cast %543 : vector<2x1xi1> to vector<2x1xi1>
    %547 = vector.broadcast %546 : vector<2x1xi1> to vector<2x32xi1>
    %548 = arith.select %547, %516, %453 : vector<2x32xi1>, vector<2x32xf32>
    %549 = vector.shape_cast %543 : vector<2x1xi1> to vector<2x1xi1>
    %550 = vector.broadcast %549 : vector<2x1xi1> to vector<2x32xi1>
    %551 = arith.select %550, %514, %456 : vector<2x32xi1>, vector<2x32xf32>
    %552 = vector.shape_cast %545 : vector<2x1xi1> to vector<2x1xi1>
    %553 = vector.broadcast %552 : vector<2x1xi1> to vector<2x32xi1>
    %554 = arith.select %553, %541, %459 : vector<2x32xi1>, vector<2x32xf32>
    %555 = vector.shape_cast %545 : vector<2x1xi1> to vector<2x1xi1>
    %556 = vector.broadcast %555 : vector<2x1xi1> to vector<2x32xi1>
    %557 = arith.select %556, %539, %462 : vector<2x32xi1>, vector<2x32xf32>
    %cst_112 = arith.constant 0.000000e+00 : f32
    %558 = vector.shape_cast %543 : vector<2x1xi1> to vector<2x1xi1>
    %559 = vector.broadcast %558 : vector<2x1xi1> to vector<2x32xi1>
    %560 = vector.broadcast %cst_112 : f32 to vector<2x32xf32>
    %561 = arith.select %559, %516, %560 : vector<2x32xi1>, vector<2x32xf32>
    %562 = arith.index_cast %c5_i32 : i32 to index
    %c0_113 = arith.constant 0 : index
    %c0_114 = arith.constant 0 : index
    %563 = vector.load %arg5[%562, %c0_113, %c0_114] : memref<8x2x32xf32, #tpu.memory_space<vmem>>, vector<1x2x32xf32>
    %564 = vector.shape_cast %563 : vector<1x2x32xf32> to vector<2x32xf32>
    %565 = vector.shape_cast %561 : vector<2x32xf32> to vector<1x2x32xf32>
    tpu.vector_store %arg5[%562, %c0_113, %c0_114], %565 {strides = array<i32>} : memref<8x2x32xf32, #tpu.memory_space<vmem>>, vector<1x2x32xf32>,
    %cst_115 = arith.constant 0.000000e+00 : f32
    %566 = vector.shape_cast %545 : vector<2x1xi1> to vector<2x1xi1>
    %567 = vector.broadcast %566 : vector<2x1xi1> to vector<2x32xi1>
    %568 = vector.broadcast %cst_115 : f32 to vector<2x32xf32>
    %569 = arith.select %567, %541, %568 : vector<2x32xi1>, vector<2x32xf32>
    %570 = arith.index_cast %479 : i32 to index
    %c0_116 = arith.constant 0 : index
    %c0_117 = arith.constant 0 : index
    %571 = vector.load %arg6[%570, %c0_116, %c0_117] : memref<8x2x32xf32, #tpu.memory_space<vmem>>, vector<1x2x32xf32>
    %572 = vector.shape_cast %571 : vector<1x2x32xf32> to vector<2x32xf32>
    %573 = vector.shape_cast %569 : vector<2x32xf32> to vector<1x2x32xf32>
    tpu.vector_store %arg6[%570, %c0_116, %c0_117], %573 {strides = array<i32>} : memref<8x2x32xf32, #tpu.memory_space<vmem>>, vector<1x2x32xf32>,
    %c6_i32 = arith.constant 6 : i32
    %c7_i32_118 = arith.constant 7 : i32
    %574 = arith.subi %c7_i32_118, %c6_i32 : i32
    %575 = arith.index_cast %c6_i32 : i32 to index
    %c0_119 = arith.constant 0 : index
    %c0_120 = arith.constant 0 : index
    %576 = vector.load %arg2[%575, %c0_119, %c0_120] : memref<8x2x256xf32, #tpu.memory_space<vmem>>, vector<1x2x256xf32>
    %577 = vector.shape_cast %576 : vector<1x2x256xf32> to vector<2x256xf32>
    %578 = arith.index_cast %574 : i32 to index
    %c0_121 = arith.constant 0 : index
    %c0_122 = arith.constant 0 : index
    %579 = vector.load %arg2[%578, %c0_121, %c0_122] : memref<8x2x256xf32, #tpu.memory_space<vmem>>, vector<1x2x256xf32>
    %580 = vector.shape_cast %579 : vector<1x2x256xf32> to vector<2x256xf32>
    %581 = vector.extract_strided_slice %577 {offsets = [0, 0], sizes = [2, 128], strides = [1, 1]} : vector<2x256xf32> to vector<2x128xf32>
    %cst_123 = arith.constant dense<0.000000e+00> : vector<2x128xf32>
    %582 = tpu.matmul %548, %1, %cst_123 {dimension_numbers = #tpu.dot_dimension_numbers<[1], [0], [0], [1], [0, 0, 1, 1], [], []>} : vector<2x32xf32>, vector<32x128xf32>, vector<2x128xf32> -> vector<2x128xf32>
    %583 = arith.addf %581, %582 : vector<2x128xf32>
    %584 = vector.extract_strided_slice %580 {offsets = [0, 128], sizes = [2, 128], strides = [1, 1]} : vector<2x256xf32> to vector<2x128xf32>
    %cst_124 = arith.constant dense<0.000000e+00> : vector<2x128xf32>
    %585 = tpu.matmul %554, %2, %cst_124 {dimension_numbers = #tpu.dot_dimension_numbers<[1], [0], [0], [1], [0, 0, 1, 1], [], []>} : vector<2x32xf32>, vector<32x128xf32>, vector<2x128xf32> -> vector<2x128xf32>
    %586 = arith.addf %584, %585 : vector<2x128xf32>
    %587 = vector.extract_strided_slice %583 {offsets = [0, 0], sizes = [2, 32], strides = [1, 1]} : vector<2x128xf32> to vector<2x32xf32>
    %588 = arith.negf %587 : vector<2x32xf32>
    %589 = math.exp %588 : vector<2x32xf32>
    %cst_125 = arith.constant 1.000000e+00 : f32
    %590 = vector.broadcast %cst_125 : f32 to vector<2x32xf32>
    %591 = arith.addf %590, %589 : vector<2x32xf32>
    %592 = arith.divf %590, %591 : vector<2x32xf32>
    %593 = vector.extract_strided_slice %583 {offsets = [0, 32], sizes = [2, 32], strides = [1, 1]} : vector<2x128xf32> to vector<2x32xf32>
    %594 = arith.negf %593 : vector<2x32xf32>
    %595 = math.exp %594 : vector<2x32xf32>
    %cst_126 = arith.constant 1.000000e+00 : f32
    %596 = vector.broadcast %cst_126 : f32 to vector<2x32xf32>
    %597 = arith.addf %596, %595 : vector<2x32xf32>
    %598 = arith.divf %596, %597 : vector<2x32xf32>
    %599 = vector.extract_strided_slice %583 {offsets = [0, 64], sizes = [2, 32], strides = [1, 1]} : vector<2x128xf32> to vector<2x32xf32>
    %600 = math.tanh %599 : vector<2x32xf32>
    %601 = vector.extract_strided_slice %583 {offsets = [0, 96], sizes = [2, 32], strides = [1, 1]} : vector<2x128xf32> to vector<2x32xf32>
    %602 = arith.negf %601 : vector<2x32xf32>
    %603 = math.exp %602 : vector<2x32xf32>
    %cst_127 = arith.constant 1.000000e+00 : f32
    %604 = vector.broadcast %cst_127 : f32 to vector<2x32xf32>
    %605 = arith.addf %604, %603 : vector<2x32xf32>
    %606 = arith.divf %604, %605 : vector<2x32xf32>
    %607 = arith.mulf %598, %551 : vector<2x32xf32>
    %608 = arith.mulf %592, %600 : vector<2x32xf32>
    %609 = arith.addf %607, %608 : vector<2x32xf32>
    %610 = math.tanh %609 : vector<2x32xf32>
    %611 = arith.mulf %606, %610 : vector<2x32xf32>
    %612 = vector.extract_strided_slice %586 {offsets = [0, 0], sizes = [2, 32], strides = [1, 1]} : vector<2x128xf32> to vector<2x32xf32>
    %613 = arith.negf %612 : vector<2x32xf32>
    %614 = math.exp %613 : vector<2x32xf32>
    %cst_128 = arith.constant 1.000000e+00 : f32
    %615 = vector.broadcast %cst_128 : f32 to vector<2x32xf32>
    %616 = arith.addf %615, %614 : vector<2x32xf32>
    %617 = arith.divf %615, %616 : vector<2x32xf32>
    %618 = vector.extract_strided_slice %586 {offsets = [0, 32], sizes = [2, 32], strides = [1, 1]} : vector<2x128xf32> to vector<2x32xf32>
    %619 = arith.negf %618 : vector<2x32xf32>
    %620 = math.exp %619 : vector<2x32xf32>
    %cst_129 = arith.constant 1.000000e+00 : f32
    %621 = vector.broadcast %cst_129 : f32 to vector<2x32xf32>
    %622 = arith.addf %621, %620 : vector<2x32xf32>
    %623 = arith.divf %621, %622 : vector<2x32xf32>
    %624 = vector.extract_strided_slice %586 {offsets = [0, 64], sizes = [2, 32], strides = [1, 1]} : vector<2x128xf32> to vector<2x32xf32>
    %625 = math.tanh %624 : vector<2x32xf32>
    %626 = vector.extract_strided_slice %586 {offsets = [0, 96], sizes = [2, 32], strides = [1, 1]} : vector<2x128xf32> to vector<2x32xf32>
    %627 = arith.negf %626 : vector<2x32xf32>
    %628 = math.exp %627 : vector<2x32xf32>
    %cst_130 = arith.constant 1.000000e+00 : f32
    %629 = vector.broadcast %cst_130 : f32 to vector<2x32xf32>
    %630 = arith.addf %629, %628 : vector<2x32xf32>
    %631 = arith.divf %629, %630 : vector<2x32xf32>
    %632 = arith.mulf %623, %557 : vector<2x32xf32>
    %633 = arith.mulf %617, %625 : vector<2x32xf32>
    %634 = arith.addf %632, %633 : vector<2x32xf32>
    %635 = math.tanh %634 : vector<2x32xf32>
    %636 = arith.mulf %631, %635 : vector<2x32xf32>
    %637 = vector.broadcast %c6_i32 : i32 to vector<2x1xi32>
    %638 = arith.cmpi slt, %637, %0 : vector<2x1xi32>
    %639 = vector.broadcast %574 : i32 to vector<2x1xi32>
    %640 = arith.cmpi slt, %639, %0 : vector<2x1xi32>
    %641 = vector.shape_cast %638 : vector<2x1xi1> to vector<2x1xi1>
    %642 = vector.broadcast %641 : vector<2x1xi1> to vector<2x32xi1>
    %643 = arith.select %642, %611, %548 : vector<2x32xi1>, vector<2x32xf32>
    %644 = vector.shape_cast %638 : vector<2x1xi1> to vector<2x1xi1>
    %645 = vector.broadcast %644 : vector<2x1xi1> to vector<2x32xi1>
    %646 = arith.select %645, %609, %551 : vector<2x32xi1>, vector<2x32xf32>
    %647 = vector.shape_cast %640 : vector<2x1xi1> to vector<2x1xi1>
    %648 = vector.broadcast %647 : vector<2x1xi1> to vector<2x32xi1>
    %649 = arith.select %648, %636, %554 : vector<2x32xi1>, vector<2x32xf32>
    %650 = vector.shape_cast %640 : vector<2x1xi1> to vector<2x1xi1>
    %651 = vector.broadcast %650 : vector<2x1xi1> to vector<2x32xi1>
    %652 = arith.select %651, %634, %557 : vector<2x32xi1>, vector<2x32xf32>
    %cst_131 = arith.constant 0.000000e+00 : f32
    %653 = vector.shape_cast %638 : vector<2x1xi1> to vector<2x1xi1>
    %654 = vector.broadcast %653 : vector<2x1xi1> to vector<2x32xi1>
    %655 = vector.broadcast %cst_131 : f32 to vector<2x32xf32>
    %656 = arith.select %654, %611, %655 : vector<2x32xi1>, vector<2x32xf32>
    %657 = arith.index_cast %c6_i32 : i32 to index
    %c0_132 = arith.constant 0 : index
    %c0_133 = arith.constant 0 : index
    %658 = vector.load %arg5[%657, %c0_132, %c0_133] : memref<8x2x32xf32, #tpu.memory_space<vmem>>, vector<1x2x32xf32>
    %659 = vector.shape_cast %658 : vector<1x2x32xf32> to vector<2x32xf32>
    %660 = vector.shape_cast %656 : vector<2x32xf32> to vector<1x2x32xf32>
    tpu.vector_store %arg5[%657, %c0_132, %c0_133], %660 {strides = array<i32>} : memref<8x2x32xf32, #tpu.memory_space<vmem>>, vector<1x2x32xf32>,
    %cst_134 = arith.constant 0.000000e+00 : f32
    %661 = vector.shape_cast %640 : vector<2x1xi1> to vector<2x1xi1>
    %662 = vector.broadcast %661 : vector<2x1xi1> to vector<2x32xi1>
    %663 = vector.broadcast %cst_134 : f32 to vector<2x32xf32>
    %664 = arith.select %662, %636, %663 : vector<2x32xi1>, vector<2x32xf32>
    %665 = arith.index_cast %574 : i32 to index
    %c0_135 = arith.constant 0 : index
    %c0_136 = arith.constant 0 : index
    %666 = vector.load %arg6[%665, %c0_135, %c0_136] : memref<8x2x32xf32, #tpu.memory_space<vmem>>, vector<1x2x32xf32>
    %667 = vector.shape_cast %666 : vector<1x2x32xf32> to vector<2x32xf32>
    %668 = vector.shape_cast %664 : vector<2x32xf32> to vector<1x2x32xf32>
    tpu.vector_store %arg6[%665, %c0_135, %c0_136], %668 {strides = array<i32>} : memref<8x2x32xf32, #tpu.memory_space<vmem>>, vector<1x2x32xf32>,
    %c7_i32_137 = arith.constant 7 : i32
    %c7_i32_138 = arith.constant 7 : i32
    %669 = arith.subi %c7_i32_138, %c7_i32_137 : i32
    %670 = arith.index_cast %c7_i32_137 : i32 to index
    %c0_139 = arith.constant 0 : index
    %c0_140 = arith.constant 0 : index
    %671 = vector.load %arg2[%670, %c0_139, %c0_140] : memref<8x2x256xf32, #tpu.memory_space<vmem>>, vector<1x2x256xf32>
    %672 = vector.shape_cast %671 : vector<1x2x256xf32> to vector<2x256xf32>
    %673 = arith.index_cast %669 : i32 to index
    %c0_141 = arith.constant 0 : index
    %c0_142 = arith.constant 0 : index
    %674 = vector.load %arg2[%673, %c0_141, %c0_142] : memref<8x2x256xf32, #tpu.memory_space<vmem>>, vector<1x2x256xf32>
    %675 = vector.shape_cast %674 : vector<1x2x256xf32> to vector<2x256xf32>
    %676 = vector.extract_strided_slice %672 {offsets = [0, 0], sizes = [2, 128], strides = [1, 1]} : vector<2x256xf32> to vector<2x128xf32>
    %cst_143 = arith.constant dense<0.000000e+00> : vector<2x128xf32>
    %677 = tpu.matmul %643, %1, %cst_143 {dimension_numbers = #tpu.dot_dimension_numbers<[1], [0], [0], [1], [0, 0, 1, 1], [], []>} : vector<2x32xf32>, vector<32x128xf32>, vector<2x128xf32> -> vector<2x128xf32>
    %678 = arith.addf %676, %677 : vector<2x128xf32>
    %679 = vector.extract_strided_slice %675 {offsets = [0, 128], sizes = [2, 128], strides = [1, 1]} : vector<2x256xf32> to vector<2x128xf32>
    %cst_144 = arith.constant dense<0.000000e+00> : vector<2x128xf32>
    %680 = tpu.matmul %649, %2, %cst_144 {dimension_numbers = #tpu.dot_dimension_numbers<[1], [0], [0], [1], [0, 0, 1, 1], [], []>} : vector<2x32xf32>, vector<32x128xf32>, vector<2x128xf32> -> vector<2x128xf32>
    %681 = arith.addf %679, %680 : vector<2x128xf32>
    %682 = vector.extract_strided_slice %678 {offsets = [0, 0], sizes = [2, 32], strides = [1, 1]} : vector<2x128xf32> to vector<2x32xf32>
    %683 = arith.negf %682 : vector<2x32xf32>
    %684 = math.exp %683 : vector<2x32xf32>
    %cst_145 = arith.constant 1.000000e+00 : f32
    %685 = vector.broadcast %cst_145 : f32 to vector<2x32xf32>
    %686 = arith.addf %685, %684 : vector<2x32xf32>
    %687 = arith.divf %685, %686 : vector<2x32xf32>
    %688 = vector.extract_strided_slice %678 {offsets = [0, 32], sizes = [2, 32], strides = [1, 1]} : vector<2x128xf32> to vector<2x32xf32>
    %689 = arith.negf %688 : vector<2x32xf32>
    %690 = math.exp %689 : vector<2x32xf32>
    %cst_146 = arith.constant 1.000000e+00 : f32
    %691 = vector.broadcast %cst_146 : f32 to vector<2x32xf32>
    %692 = arith.addf %691, %690 : vector<2x32xf32>
    %693 = arith.divf %691, %692 : vector<2x32xf32>
    %694 = vector.extract_strided_slice %678 {offsets = [0, 64], sizes = [2, 32], strides = [1, 1]} : vector<2x128xf32> to vector<2x32xf32>
    %695 = math.tanh %694 : vector<2x32xf32>
    %696 = vector.extract_strided_slice %678 {offsets = [0, 96], sizes = [2, 32], strides = [1, 1]} : vector<2x128xf32> to vector<2x32xf32>
    %697 = arith.negf %696 : vector<2x32xf32>
    %698 = math.exp %697 : vector<2x32xf32>
    %cst_147 = arith.constant 1.000000e+00 : f32
    %699 = vector.broadcast %cst_147 : f32 to vector<2x32xf32>
    %700 = arith.addf %699, %698 : vector<2x32xf32>
    %701 = arith.divf %699, %700 : vector<2x32xf32>
    %702 = arith.mulf %693, %646 : vector<2x32xf32>
    %703 = arith.mulf %687, %695 : vector<2x32xf32>
    %704 = arith.addf %702, %703 : vector<2x32xf32>
    %705 = math.tanh %704 : vector<2x32xf32>
    %706 = arith.mulf %701, %705 : vector<2x32xf32>
    %707 = vector.extract_strided_slice %681 {offsets = [0, 0], sizes = [2, 32], strides = [1, 1]} : vector<2x128xf32> to vector<2x32xf32>
    %708 = arith.negf %707 : vector<2x32xf32>
    %709 = math.exp %708 : vector<2x32xf32>
    %cst_148 = arith.constant 1.000000e+00 : f32
    %710 = vector.broadcast %cst_148 : f32 to vector<2x32xf32>
    %711 = arith.addf %710, %709 : vector<2x32xf32>
    %712 = arith.divf %710, %711 : vector<2x32xf32>
    %713 = vector.extract_strided_slice %681 {offsets = [0, 32], sizes = [2, 32], strides = [1, 1]} : vector<2x128xf32> to vector<2x32xf32>
    %714 = arith.negf %713 : vector<2x32xf32>
    %715 = math.exp %714 : vector<2x32xf32>
    %cst_149 = arith.constant 1.000000e+00 : f32
    %716 = vector.broadcast %cst_149 : f32 to vector<2x32xf32>
    %717 = arith.addf %716, %715 : vector<2x32xf32>
    %718 = arith.divf %716, %717 : vector<2x32xf32>
    %719 = vector.extract_strided_slice %681 {offsets = [0, 64], sizes = [2, 32], strides = [1, 1]} : vector<2x128xf32> to vector<2x32xf32>
    %720 = math.tanh %719 : vector<2x32xf32>
    %721 = vector.extract_strided_slice %681 {offsets = [0, 96], sizes = [2, 32], strides = [1, 1]} : vector<2x128xf32> to vector<2x32xf32>
    %722 = arith.negf %721 : vector<2x32xf32>
    %723 = math.exp %722 : vector<2x32xf32>
    %cst_150 = arith.constant 1.000000e+00 : f32
    %724 = vector.broadcast %cst_150 : f32 to vector<2x32xf32>
    %725 = arith.addf %724, %723 : vector<2x32xf32>
    %726 = arith.divf %724, %725 : vector<2x32xf32>
    %727 = arith.mulf %718, %652 : vector<2x32xf32>
    %728 = arith.mulf %712, %720 : vector<2x32xf32>
    %729 = arith.addf %727, %728 : vector<2x32xf32>
    %730 = math.tanh %729 : vector<2x32xf32>
    %731 = arith.mulf %726, %730 : vector<2x32xf32>
    %732 = vector.broadcast %c7_i32_137 : i32 to vector<2x1xi32>
    %733 = arith.cmpi slt, %732, %0 : vector<2x1xi32>
    %734 = vector.broadcast %669 : i32 to vector<2x1xi32>
    %735 = arith.cmpi slt, %734, %0 : vector<2x1xi32>
    %736 = vector.shape_cast %733 : vector<2x1xi1> to vector<2x1xi1>
    %737 = vector.broadcast %736 : vector<2x1xi1> to vector<2x32xi1>
    %738 = arith.select %737, %706, %643 : vector<2x32xi1>, vector<2x32xf32>
    %739 = vector.shape_cast %733 : vector<2x1xi1> to vector<2x1xi1>
    %740 = vector.broadcast %739 : vector<2x1xi1> to vector<2x32xi1>
    %741 = arith.select %740, %704, %646 : vector<2x32xi1>, vector<2x32xf32>
    %742 = vector.shape_cast %735 : vector<2x1xi1> to vector<2x1xi1>
    %743 = vector.broadcast %742 : vector<2x1xi1> to vector<2x32xi1>
    %744 = arith.select %743, %731, %649 : vector<2x32xi1>, vector<2x32xf32>
    %745 = vector.shape_cast %735 : vector<2x1xi1> to vector<2x1xi1>
    %746 = vector.broadcast %745 : vector<2x1xi1> to vector<2x32xi1>
    %747 = arith.select %746, %729, %652 : vector<2x32xi1>, vector<2x32xf32>
    %cst_151 = arith.constant 0.000000e+00 : f32
    %748 = vector.shape_cast %733 : vector<2x1xi1> to vector<2x1xi1>
    %749 = vector.broadcast %748 : vector<2x1xi1> to vector<2x32xi1>
    %750 = vector.broadcast %cst_151 : f32 to vector<2x32xf32>
    %751 = arith.select %749, %706, %750 : vector<2x32xi1>, vector<2x32xf32>
    %752 = arith.index_cast %c7_i32_137 : i32 to index
    %c0_152 = arith.constant 0 : index
    %c0_153 = arith.constant 0 : index
    %753 = vector.load %arg5[%752, %c0_152, %c0_153] : memref<8x2x32xf32, #tpu.memory_space<vmem>>, vector<1x2x32xf32>
    %754 = vector.shape_cast %753 : vector<1x2x32xf32> to vector<2x32xf32>
    %755 = vector.shape_cast %751 : vector<2x32xf32> to vector<1x2x32xf32>
    tpu.vector_store %arg5[%752, %c0_152, %c0_153], %755 {strides = array<i32>} : memref<8x2x32xf32, #tpu.memory_space<vmem>>, vector<1x2x32xf32>,
    %cst_154 = arith.constant 0.000000e+00 : f32
    %756 = vector.shape_cast %735 : vector<2x1xi1> to vector<2x1xi1>
    %757 = vector.broadcast %756 : vector<2x1xi1> to vector<2x32xi1>
    %758 = vector.broadcast %cst_154 : f32 to vector<2x32xf32>
    %759 = arith.select %757, %731, %758 : vector<2x32xi1>, vector<2x32xf32>
    %760 = arith.index_cast %669 : i32 to index
    %c0_155 = arith.constant 0 : index
    %c0_156 = arith.constant 0 : index
    %761 = vector.load %arg6[%760, %c0_155, %c0_156] : memref<8x2x32xf32, #tpu.memory_space<vmem>>, vector<1x2x32xf32>
    %762 = vector.shape_cast %761 : vector<1x2x32xf32> to vector<2x32xf32>
    %763 = vector.shape_cast %759 : vector<2x32xf32> to vector<1x2x32xf32>
    tpu.vector_store %arg6[%760, %c0_155, %c0_156], %763 {strides = array<i32>} : memref<8x2x32xf32, #tpu.memory_space<vmem>>, vector<1x2x32xf32>,
    %c8_i32 = arith.constant 8 : i32
    return
  }
  func.func @transform_0(%arg0: i32) -> (i32, i32) {
    %c0_i32 = arith.constant 0 : i32
    %c0_i32_0 = arith.constant 0 : i32
    %c0_i32_1 = arith.constant 0 : i32
    return %c0_i32, %c0_i32_0 : i32, i32
  }
  func.func @transform_1(%arg0: i32) -> (i32, i32, i32) {
    %c0_i32 = arith.constant 0 : i32
    %c0_i32_0 = arith.constant 0 : i32
    %c0_i32_1 = arith.constant 0 : i32
    %c0_i32_2 = arith.constant 0 : i32
    return %c0_i32, %c0_i32_0, %c0_i32_1 : i32, i32, i32
  }
  func.func @transform_2(%arg0: i32) -> (i32, i32) {
    %c0_i32 = arith.constant 0 : i32
    %c0_i32_0 = arith.constant 0 : i32
    %c0_i32_1 = arith.constant 0 : i32
    return %c0_i32, %c0_i32_0 : i32, i32
  }
  func.func @transform_3(%arg0: i32) -> (i32, i32) {
    %c0_i32 = arith.constant 0 : i32
    %c0_i32_0 = arith.constant 0 : i32
    %c0_i32_1 = arith.constant 0 : i32
    return %c0_i32, %c0_i32_0 : i32, i32
  }
  func.func @transform_4(%arg0: i32) -> (i32, i32, i32) {
    %c0_i32 = arith.constant 0 : i32
    %c0_i32_0 = arith.constant 0 : i32
    %c0_i32_1 = arith.constant 0 : i32
    %c0_i32_2 = arith.constant 0 : i32
    return %c0_i32, %c0_i32_0, %c0_i32_1 : i32, i32, i32
  }
  func.func @transform_5(%arg0: i32) -> (i32, i32, i32) {
    %c0_i32 = arith.constant 0 : i32
    %c0_i32_0 = arith.constant 0 : i32
    %c0_i32_1 = arith.constant 0 : i32
    %c0_i32_2 = arith.constant 0 : i32
    return %c0_i32, %c0_i32_0, %c0_i32_1 : i32, i32, i32
  }
}

</mosaic_0001>

<bundles_post_ra>
// kernel: tpu_custom_call.1
= control target key start
LH: loop header
LB: loop body
LE: loop exit
PB: predicated region body
PF: predicated region fallthrough
CT: control target
= control target key end

     0   :  { %11 = vsyncpa [#allocation3], 0  ;;  %s2403_s0 = inlined_call_operand.vmem [shape: s32[2,1], index: 0, kind: input, shape index: {}]   ;;  %s2404_s1 = inlined_call_operand.hbm [shape: f32[8,2,256], index: 1, kind: input, shape index: {}]   ;;  %s2405_s2 = inlined_call_operand.hbm [shape: f32[32,128], index: 2, kind: input, shape index: {}]   ;;  %s2406_s3 = inlined_call_operand.hbm [shape: f32[32,128], index: 3, kind: input, shape index: {}]   ;;  %s2407_s4 = inlined_call_operand.hbm [shape: f32[8,2,32], index: 4, kind: output, shape index: {0}]   ;;  %s2408_s5 = inlined_call_operand.hbm [shape: f32[8,2,32], index: 5, kind: output, shape index: {1}]  }
   0x1   :  { %12 = vsyncpa [#allocation6], 0 }
   0x2   :  { %13 = vsyncpa [#allocation4], 0  ;;  %s34_s20 = sshll.u32 %s2405_s2, 4  ;;  %s35_s20 = int_to_ptr.hbm [resolvable:$true] %s34_s20 }
   0x3   :  { %14 = vsyncpa [#allocation10], 0  ;;  %s1856_s21 = smov [#allocation5]   ;;  %s21_s25 = sshll.u32 %s2404_s1, 4  ;;  %s22_s25 = int_to_ptr.hbm [resolvable:$true] %s21_s25 }
   0x4   :  { %s36_s22 = sshll.u32 %s1856_s21, 4  ;;  %s1857_s26 = smov 128   ;;  %s37_s22 = int_to_ptr.vmem [resolvable:$true] %s36_s22 }
   0x5   :  { %s1858_s27 = smov 8   ;;  %s1859_s28 = smov [#allocation2]  }
   0x6   :  { %42 = dma.hbm_to_vmem [thread:$0]  %s35_s20, 512, %s37_s22, [#allocation6], %s1857_s26, %s1857_s26, %s1858_s27  }
   0x7   :  { %s23_s29 = sshll.u32 %s1859_s28, 4  ;;  %s1860_s30 = smov 64   ;;  %s24_s29 = int_to_ptr.vmem [resolvable:$true] %s23_s29 }
   0x8   :  { %s1861_s6 = smov 4   ;;  %s47_s8 = sshll.u32 %s2406_s3, 4  ;;  %s48_s8 = int_to_ptr.hbm [resolvable:$true] %s47_s8 }
   0x9   :  { %29 = dma.hbm_to_vmem [thread:$0]  %s22_s25, 512, %s24_s29, [#allocation3], %s1860_s30, %s1860_s30, %s1861_s6  }
   0xa   :  { %s1862_s9 = smov [#allocation7]  }
   0xb   :  { %s49_s10 = sshll.u32 %s1862_s9, 4  ;;  %s50_s10 = int_to_ptr.vmem [resolvable:$true] %s49_s10 }
   0xc   :  { %55 = dma.hbm_to_vmem [thread:$0]  %s48_s8, 512, %s50_s10, [#allocation6], %s1857_s26, %s1857_s26, %s1858_s27  }
   0xd   :  { %1848 = dma.done.wait [#allocation3], 512  }
   0xe   :  { %1849 = vsyncadd [#allocation3], 4294966784 }
   0xf   :  { %1850 = dma.done.wait [#allocation6], 1024  }
  0x10   :  { %1851 = vsyncadd [#allocation6], 4294966272  ;;  %v1911_v0 = vld [vmem:[#allocation5 + $0x18] sm:$0xff]  ;;  %v1913_v1 = vld [vmem:[#allocation5 + $0x10] sm:$0xff]  ;;  %v1863_v8 = vmov 0.0   ;;  %s1864_s1 = smov 32  }
  0x11   :  { %96 = vmatpush.msra.mxu0 %v1911_v0  ;;  %v1916_v2 = vld [vmem:[#allocation7 + $0x18] sm:$0xff]  ;;  %v1918_v3 = vld [vmem:[#allocation7 + $0x10] sm:$0xff]  ;;  %266 = vmatpush.msra.mxu2 %v1911_v0  ;;  %v1921_v4 = vld [vmem:[#allocation5 + $0x8] sm:$0xff]  ;;  %v1865_v49 = vmov 0   ;;  %vm243_vm10 = vcmask 254976   ;;  %vm80_vm11 = vcmask 261120  }
  0x12   :  { %117 = vmatpush.msra.mxu1 %v1916_v2  ;;  %290 = vmatpush.msra.mxu3 %v1916_v2  ;;  %v1926_v5 = vld [vmem:[#allocation7 + $0x8] sm:$0xff]  ;;  %v1929_v6 = vld [vmem:[#allocation5] sm:$0xff]  ;;  %v79_v10 = vld [vmem:[#allocation2 + $0x1c] sm:$0xf]  ;;  %s1867_s12 = smov [#allocation8]   ;;  %s1521_s16 = sshll.u32 %s2407_s4, 4  ;;  %s1522_s16 = int_to_ptr.hbm [resolvable:$true] %s1521_s16 }
  0x13   :  { %97 = vmatpush.msra.mxu0 %v1913_v1  ;;  %267 = vmatpush.msra.mxu2 %v1913_v1  ;;  %v1934_v7 = vld [vmem:[#allocation7] sm:$0xff]  ;;  %v126_v13 = vrot.slane %v79_v10, 2  ;;  %v1974_v48 = vld [vmem:[%s2403_s0] sm:$0x3]  ;;  %s1866_s0 = smov 96   ;;  %s1519_s13 = sshll.u32 %s1867_s12, 4  ;;  %s1520_s13 = int_to_ptr.vmem [resolvable:$true] %s1519_s13 }
  0x14   :  { %118 = vmatpush.msra.mxu1 %v1918_v3  ;;  %291 = vmatpush.msra.mxu3 %v1918_v3  ;;  %v77_v9 = vld [vmem:[#allocation2] sm:$0xf]  ;;  %vm203_vm8 = vcmp.gt.s32.totalorder %v1974_v48, 0  ;;  %vm204_vm9 = vcmp.gt.s32.totalorder %v1974_v48, 7  ;;  %s1868_s17 = smov 2   ;;  %s1869_s18 = smov [#allocation9]  }
  0x15   :  { %98 = vmatpush.msra.mxu0 %v1921_v4  ;;  %268 = vmatpush.msra.mxu2 %v1921_v4  ;;  %v205_v50 = vsel %vm203_vm8, 1, %v1865_v49  ;;  %v224_v59 = vsel %vm204_vm9, 1, %v1865_v49  ;;  %s1532_s19 = sshll.u32 %s1869_s18, 4  ;;  %s1534_s22 = sshll.u32 %s2408_s5, 4  ;;  %s1533_s19 = int_to_ptr.vmem [resolvable:$true] %s1532_s19  ;;  %s1535_s22 = int_to_ptr.hbm [resolvable:$true] %s1534_s22 }
  0x16   :  { %119 = vmatpush.msra.mxu1 %v1926_v5  ;;  %292 = vmatpush.msra.mxu3 %v1926_v5 }
  0x17   :  { %99 = vmatpush.msra.mxu0 %v1929_v6  ;;  %269 = vmatpush.msra.mxu2 %v1929_v6 }
  0x18   :  { %100 = vmatmul.f32.vlgmr.msra.gmra.mxu0 %v1863_v8  ;;  %120 = vmatpush.msra.mxu1 %v1934_v7 }
  0x19   :  { %121 = vmatmul.f32.vlgmr.msra.gmra.mxu1 %v1863_v8  ;;  %293 = vmatpush.msra.mxu3 %v1934_v7 }
  0x1a   :  { %459 = vmatpush.msrb.mxu0 %v1911_v0  ;;  %483 = vmatpush.msrb.mxu1 %v1916_v2 }
  0x1b   :  { %676 = vmatpush.msrb.mxu3 %v1916_v2  ;;  %652 = vmatpush.msrb.mxu2 %v1911_v0 }
  0x1c   :  { %460 = vmatpush.msrb.mxu0 %v1913_v1  ;;  %484 = vmatpush.msrb.mxu1 %v1918_v3 }
  0x1d   :  { %677 = vmatpush.msrb.mxu3 %v1918_v3  ;;  %653 = vmatpush.msrb.mxu2 %v1913_v1 }
  0x1e   :  { %461 = vmatpush.msrb.mxu0 %v1921_v4  ;;  %485 = vmatpush.msrb.mxu1 %v1926_v5 }
  0x1f   :  { %678 = vmatpush.msrb.mxu3 %v1926_v5  ;;  %654 = vmatpush.msrb.mxu2 %v1921_v4 }
  0x20   :  { %462 = vmatpush.msrb.mxu0 %v1929_v6  ;;  %486 = vmatpush.msrb.mxu1 %v1934_v7 }
  0x21   :  { %679 = vmatpush.msrb.mxu3 %v1934_v7  ;;  %655 = vmatpush.msrb.mxu2 %v1929_v6 }
  0x22   :  { %843 = vmatpush.msra.mxu0 %v1911_v0  ;;  %867 = vmatpush.msra.mxu1 %v1916_v2 }
  0x23   :  { %1597 = vset.pattern.permute.xlu0 %v1865_v49  ;;  %1598 = vset.pattern.permute.xlu2 %v1865_v49 }
  0x24   :  { %844 = vmatpush.msra.mxu0 %v1913_v1  ;;  %868 = vmatpush.msra.mxu1 %v1918_v3 }
  0x25   :  { %1599 = vset.pattern.permute.xlu1 %v1865_v49 }
  0x26   :  { %845 = vmatpush.msra.mxu0 %v1921_v4  ;;  %869 = vmatpush.msra.mxu1 %v1926_v5 }
  0x28   :  { %846 = vmatpush.msra.mxu0 %v1929_v6  ;;  %870 = vmatpush.msra.mxu1 %v1934_v7 }
  0x95   :  { %v101_v11 = vpop.f32.mrf.mxu0 }
  0x96   :  { %v104_v12 = vadd.f32 %v101_v11, %v77_v9  ;;  %v122_v14 = vpop.f32.mrf.mxu1 }
  0x97   :  { %v128_v15 = vadd.f32 %v126_v13, %v122_v14 }
  0x98   :  { %1600 = vtanh.f32 %v104_v12  ;;  %v1553_v18 = vmul.f32 -1.442695, %v104_v12 }
  0x99   :  { %1602 = vtanh.f32 %v128_v15  ;;  %v1554_v19 = vmul.f32 -1.442695, %v128_v15 }
  0x9a   :  { %1604 = vpow2.f32 %v1553_v18  ;;  %v248_v18 = vld [vmem:[#allocation2 + $0x4] sm:$0xf] }
  0x9b   :  { %1606 = vpow2.f32 %v1554_v19 }
  0x9e   :  { %v1601_v16 = vpop.eup %1600 }
  0x9f   :  { %151 = vrot.lane.b32.xlu0 %v1601_v16, %s1860_s30  ;;  %v1603_v17 = vpop.eup %1602 }
  0xa0   :  { %v1605_v20 = vpop.eup %1604 }
  0xa1   :  { %v132_v21 = vadd.f32 1.0, %v1605_v20  ;;  %v1607_v22 = vpop.eup %1606 }
  0xa2   :  { %v169_v23 = vadd.f32 1.0, %v1607_v22  ;;  %v250_v22 = vld [vmem:[#allocation2 + $0x18] sm:$0xf] }
  0xa3   :  { %1608 = vrcp.f32 %v132_v21  ;;  %v144_v32 = vand.u32 2147483648, %v132_v21  ;;  %vm138_vm1 = vweird.f32 %v132_v21  ;;  %v142_v33 = vand.u32 2147483647, %v132_v21 }
  0xa4   :  { %1610 = vrcp.f32 %v169_v23  ;;  %vm175_vm3 = vweird.f32 %v169_v23  ;;  %v181_v37 = vand.u32 2147483648, %v169_v23  ;;  %v179_v39 = vand.u32 2147483647, %v169_v23 }
  0xa5   :  { %v145_v36 = vor.u32 1.1754944e-38, %v144_v32  ;;  %vm143_vm5 = vcmp.eq.f32.partialorder %v142_v33, 8.507059e+37 }
  0xa6   :  { %v182_v43 = vor.u32 1.1754944e-38, %v181_v37  ;;  %vm180_vm7 = vcmp.eq.f32.partialorder %v179_v39, 8.507059e+37 }
  0xa7   :  { %188 = vrot.lane.b32.xlu0 %v1603_v17, %s1860_s30 }
  0xa9   :  { %v1609_v24 = vpop.eup %1608 }
  0xaa   :  { %v134_v25 = vmul.f32 %v1609_v24, %v132_v21  ;;  %v1611_v26 = vpop.eup %1610  ;;  %vm139_vm0 = vweird.f32 %v1609_v24 }
  0xab   :  { %v171_v28 = vmul.f32 %v1611_v26, %v169_v23  ;;  %vm140_vm2 = vmor %vm138_vm1, %vm139_vm0  ;;  %vm176_vm4 = vweird.f32 %v1611_v26  ;;  %v299_v23 = vrot.slane %v250_v22, 2 }
  0xac   :  { %v135_v27 = vsub.f32 1.0, %v134_v25  ;;  %vm177_vm6 = vmor %vm175_vm3, %vm176_vm4 }
  0xad   :  { %v172_v30 = vsub.f32 1.0, %v171_v28 }
  0xae   :  { %v136_v29 = vmul.f32 %v1609_v24, %v135_v27 }
  0xaf   :  { %v173_v34 = vmul.f32 %v1611_v26, %v172_v30  ;;  %207 = vperm.xlu0 %1597, %v205_v50  }
  0xb0   :  { %v137_v31 = vadd.f32 %v1609_v24, %v136_v29 }
  0xb1   :  { %v174_v38 = vadd.f32 %v1611_v26, %v173_v34 }
  0xb2   :  { %v141_v35 = vsel %vm140_vm2, %v1609_v24, %v137_v31 }
  0xb3   :  { %v146_v41 = vsel %vm143_vm5, %v145_v36, %v141_v35  ;;  %v178_v44 = vsel %vm177_vm6, %v1611_v26, %v174_v38  ;;  %vm384_vm5 = vcmp.gt.s32.totalorder %v1974_v48, 1 }
  0xb4   :  { %v183_v45 = vsel %vm180_vm7, %v182_v43, %v178_v44  ;;  %v149_v51 = vmul.f32 0.0, %v146_v41  ;;  %vm385_vm7 = vcmp.gt.s32.totalorder %v1974_v48, 6 }
  0xb5   :  { %v186_v54 = vmul.f32 0.0, %v183_v45 }
 0x111   :  { %v152_v40 = vpop.permute.xlu0 %151 }
 0x112   :  { %v154_v42 = vmul.f32 %v152_v40, %v146_v41 }
 0x114   :  { %156 = vrot.lane.b32.xlu1 %v154_v42, %s1864_s1 }
 0x119   :  { %v189_v46 = vpop.permute.xlu0 %188 }
 0x11a   :  { %v191_v47 = vmul.f32 %v189_v46, %v183_v45 }
 0x11c   :  { %193 = vrot.lane.b32.xlu1 %v191_v47, %s1864_s1 }
 0x121   :  { %v1989_v12 = vpop.permute.xlu0 %207 }
 0x122   :  { %vm2409_vm12 = vcmp.eq.s32.totalorder %v1989_v12, 1 }
 0x186   :  { %v157_v52 = vpop.permute.xlu1 %156 }
 0x187   :  { %v159_v53 = vadd.f32 %v157_v52, %v149_v51 }
 0x189   :  { %1612 = vtanh.f32 %v159_v53 }
 0x18e   :  { %v194_v55 = vpop.permute.xlu1 %193 }
 0x18f   :  { %v1613_v56 = vpop.eup %1612  ;;  %v196_v57 = vadd.f32 %v194_v55, %v186_v54 }
 0x190   :  { %162 = vrot.lane.b32.xlu2 %v1613_v56, %s1860_s30 }
 0x191   :  { %1614 = vtanh.f32 %v196_v57 }
 0x197   :  { %v1615_v58 = vpop.eup %1614 }
 0x198   :  { %199 = vrot.lane.b32.xlu2 %v1615_v58, %s1860_s30 }
 0x1a0   :  { %226 = vperm.xlu2 %1598, %v224_v59  }
 0x1ea   :  { %v163_v60 = vpop.permute.xlu2 %162 }
 0x1eb   :  { %v165_v61 = vmul.f32 %v163_v60, %v146_v41 }
 0x1ed   :  { %211 = vst [vmem:[#allocation1] ss:$4 sm:$0xff] %v165_v61 }
 0x1f2   :  { %v200_v63 = vpop.permute.xlu2 %199 }
 0x1f3   :  { %v202_v8 = vmul.f32 %v200_v63, %v183_v45 }
 0x1f4   :  { %v212_v62 = vld.sshfl [vmem:[#allocation1] sm:$0xff pattern:$0x73625140] }
 0x1f5   :  { %218 = vst [vmem:[#allocation1] ss:$4 sm:$0xff] %v159_v53  ;;  %213 = vrot.lane.b32.xlu1 %v212_v62, %s1864_s1  ;;  %v386_v62 = vsel %vm384_vm5, 1, %v1865_v49 }
 0x1fa   :  { %v2004_v15 = vpop.permute.xlu2 %226 }
 0x1fb   :  { %vm2410_vm13 = vcmp.eq.s32.totalorder %v2004_v15, 1 }
 0x1fc   :  { %v219_v9 = vld.sshfl [vmem:[#allocation1] sm:$0xff pattern:$0x73625140] }
 0x1fd   :  { %230 = vst [vmem:[#allocation1] ss:$4 sm:$0xff] %v202_v8  ;;  %220 = vrot.lane.b32.xlu2 %v219_v9, %s1866_s0 }
 0x204   :  { %v231_v10 = vld.sshfl [vmem:[#allocation1] sm:$0xff pattern:$0x73625140] }
 0x205   :  { %237 = vst [vmem:[#allocation1] ss:$4 sm:$0xff] %v196_v57  ;;  %232 = vrot.lane.b32.xlu1 %v231_v10, %s1864_s1 }
 0x20c   :  { %v238_v11 = vld.sshfl [vmem:[#allocation1] sm:$0xff pattern:$0x73625140] }
 0x20d   :  { %239 = vrot.lane.b32.xlu1 %v238_v11, %s1866_s0 }
 0x257   :  { %v221_v24 = vpop.permute.xlu2 %220 }
 0x258   :  { %v2022_v26 = vsel %vm2409_vm12, %v221_v24, 0.0 }
 0x267   :  { %v214_v13 = vpop.permute.xlu1 %213 }
 0x268   :  { %v1994_v14 = vsel %vm2409_vm12, %v214_v13, 0.0 }
 0x269   :  { %244 = vst.msk [vmem:[#allocation8] sm:$0x3] %vm243_vm10, %v1994_v14  ;;  %1555 = vmatmul.msk.f32.vlgmr.msra.gmra.mxu2 %vm80_vm11, %v1994_v14 }
 0x26a   :  { %1022 = vmatpush.msra.mxu2 %v1911_v0 }
 0x26c   :  { %1023 = vmatpush.msra.mxu2 %v1913_v1 }
 0x26e   :  { %1024 = vmatpush.msra.mxu2 %v1921_v4 }
 0x270   :  { %1025 = vmatpush.msra.mxu2 %v1929_v6 }
 0x277   :  { %v233_v16 = vpop.permute.xlu1 %232 }
 0x278   :  { %v2009_v17 = vsel %vm2410_vm13, %v233_v16, 0.0 }
 0x279   :  { %246 = vst.msk [vmem:[#allocation9 + $0xe] sm:$0x3] %vm243_vm10, %v2009_v17  ;;  %1556 = vmatmul.msk.f32.vlgmr.msra.gmra.mxu3 %vm80_vm11, %v2009_v17 }
 0x27a   :  { %1046 = vmatpush.msra.mxu3 %v1916_v2 }
 0x27c   :  { %1047 = vmatpush.msra.mxu3 %v1918_v3 }
 0x27e   :  { %1048 = vmatpush.msra.mxu3 %v1926_v5 }
 0x27f   :  { %v240_v29 = vpop.permute.xlu1 %239 }
 0x280   :  { %1049 = vmatpush.msra.mxu3 %v1934_v7  ;;  %v2029_v30 = vsel %vm2410_vm13, %v240_v29, 0.0 }
 0x2ec   :  { %v271_v19 = vpop.f32.mrf.mxu2 }
 0x2ed   :  { %v274_v20 = vadd.f32 %v271_v19, %v248_v18 }
 0x2ef   :  { %1616 = vtanh.f32 %v274_v20  ;;  %v1557_v32 = vmul.f32 -1.442695, %v274_v20 }
 0x2f5   :  { %v1617_v21 = vpop.eup %1616 }
 0x2f6   :  { %328 = vrot.lane.b32.xlu0 %v1617_v21, %s1860_s30  ;;  %v405_v21 = vsel %vm385_vm7, 1, %v1865_v49  ;;  %vm578_vm7 = vcmp.gt.s32.totalorder %v1974_v48, 5 }
 0x2fc   :  { %v295_v25 = vpop.f32.mrf.mxu3 }
 0x2fd   :  { %v301_v27 = vadd.f32 %v299_v23, %v295_v25 }
 0x2fe   :  { %323 = vrot.lane.b32.xlu0 %v2022_v26, %s1864_s1 }
 0x2ff   :  { %1618 = vtanh.f32 %v301_v27  ;;  %v1558_v31 = vmul.f32 -1.442695, %v301_v27 }
 0x301   :  { %1620 = vpow2.f32 %v1558_v31 }
 0x302   :  { %1622 = vpow2.f32 %v1557_v32 }
 0x305   :  { %v1619_v28 = vpop.eup %1618 }
 0x306   :  { %369 = vrot.lane.b32.xlu2 %v1619_v28, %s1860_s30 }
 0x307   :  { %v1621_v33 = vpop.eup %1620 }
 0x308   :  { %v346_v34 = vadd.f32 1.0, %v1621_v33  ;;  %v1623_v35 = vpop.eup %1622 }
 0x309   :  { %v305_v36 = vadd.f32 1.0, %v1623_v35 }
 0x30a   :  { %1624 = vrcp.f32 %v346_v34  ;;  %v358_v45 = vand.u32 2147483648, %v346_v34  ;;  %vm352_vm15 = vweird.f32 %v346_v34  ;;  %v356_v46 = vand.u32 2147483647, %v346_v34 }
 0x30b   :  { %1626 = vrcp.f32 %v305_v36  ;;  %v317_v56 = vand.u32 2147483648, %v305_v36  ;;  %vm311_vm3 = vweird.f32 %v305_v36  ;;  %v315_v57 = vand.u32 2147483647, %v305_v36 }
 0x30c   :  { %v359_v51 = vor.u32 1.1754944e-38, %v358_v45  ;;  %vm357_vm1 = vcmp.eq.f32.partialorder %v356_v46, 8.507059e+37 }
 0x30d   :  { %v318_v59 = vor.u32 1.1754944e-38, %v317_v56  ;;  %vm316_vm6 = vcmp.eq.f32.partialorder %v315_v57, 8.507059e+37 }
 0x30e   :  { %364 = vrot.lane.b32.xlu2 %v2029_v30, %s1864_s1 }
 0x310   :  { %v1625_v37 = vpop.eup %1624 }
 0x311   :  { %v348_v38 = vmul.f32 %v1625_v37, %v346_v34  ;;  %v1627_v40 = vpop.eup %1626  ;;  %vm353_vm14 = vweird.f32 %v1625_v37 }
 0x312   :  { %v307_v42 = vmul.f32 %v1627_v40, %v305_v36  ;;  %vm354_vm0 = vmor %vm352_vm15, %vm353_vm14  ;;  %vm312_vm2 = vweird.f32 %v1627_v40 }
 0x313   :  { %v349_v39 = vsub.f32 1.0, %v348_v38  ;;  %vm313_vm4 = vmor %vm311_vm3, %vm312_vm2 }
 0x314   :  { %v308_v44 = vsub.f32 1.0, %v307_v42 }
 0x315   :  { %v350_v41 = vmul.f32 %v1625_v37, %v349_v39  ;;  %v441_v39 = vld [vmem:[#allocation2 + $0x8] sm:$0xf] }
 0x316   :  { %v309_v50 = vmul.f32 %v1627_v40, %v308_v44 }
 0x317   :  { %v351_v43 = vadd.f32 %v1625_v37, %v350_v41 }
 0x318   :  { %v310_v55 = vadd.f32 %v1627_v40, %v309_v50 }
 0x319   :  { %v355_v47 = vsel %vm354_vm0, %v1625_v37, %v351_v43 }
 0x31a   :  { %v360_v52 = vsel %vm357_vm1, %v359_v51, %v355_v47  ;;  %v314_v58 = vsel %vm313_vm4, %v1627_v40, %v310_v55 }
 0x31b   :  { %v319_v61 = vsel %vm316_vm6, %v318_v59, %v314_v58  ;;  %vm577_vm6 = vcmp.gt.s32.totalorder %v1974_v48, 2 }
 0x360   :  { %v370_v53 = vpop.permute.xlu2 %369 }
 0x361   :  { %v372_v54 = vmul.f32 %v370_v53, %v360_v52 }
 0x363   :  { %374 = vrot.lane.b32.xlu0 %v372_v54, %s1864_s1 }
 0x368   :  { %v329_v60 = vpop.permute.xlu0 %328  ;;  %v365_v9 = vpop.permute.xlu2 %364 }
 0x369   :  { %v331_v63 = vmul.f32 %v329_v60, %v319_v61  ;;  %v367_v10 = vmul.f32 %v365_v9, %v360_v52 }
 0x36b   :  { %388 = vperm.xlu0 %1597, %v386_v62   ;;  %333 = vrot.lane.b32.xlu1 %v331_v63, %s1864_s1 }
 0x370   :  { %v324_v8 = vpop.permute.xlu0 %323 }
 0x371   :  { %v326_v16 = vmul.f32 %v324_v8, %v319_v61 }
 0x3d5   :  { %v375_v11 = vpop.permute.xlu0 %374 }
 0x3d6   :  { %v377_v13 = vadd.f32 %v375_v11, %v367_v10 }
 0x3d8   :  { %1628 = vtanh.f32 %v377_v13 }
 0x3dd   :  { %v334_v18 = vpop.permute.xlu1 %333  ;;  %v2047_v34 = vpop.permute.xlu0 %388 }
 0x3de   :  { %v1629_v19 = vpop.eup %1628  ;;  %v336_v20 = vadd.f32 %v334_v18, %v326_v16  ;;  %vm390_vm8 = vcmp.eq.s32.totalorder %v2047_v34, 1 }
 0x3df   :  { %380 = vrot.lane.b32.xlu2 %v1629_v19, %s1860_s30 }
 0x3e0   :  { %1630 = vtanh.f32 %v336_v20 }
 0x3e6   :  { %v1631_v22 = vpop.eup %1630 }
 0x3e7   :  { %407 = vperm.xlu2 %1598, %v405_v21   ;;  %339 = vrot.lane.b32.xlu1 %v1631_v22, %s1860_s30 }
 0x439   :  { %v381_v27 = vpop.permute.xlu2 %380 }
 0x43a   :  { %v383_v28 = vmul.f32 %v381_v27, %v360_v52 }
 0x441   :  { %v2061_v37 = vpop.permute.xlu2 %407 }
 0x442   :  { %vm409_vm9 = vcmp.eq.s32.totalorder %v2061_v37, 1 }
 0x459   :  { %v340_v23 = vpop.permute.xlu1 %339 }
 0x45a   :  { %v342_v24 = vmul.f32 %v340_v23, %v319_v61 }
 0x45c   :  { %392 = vst [vmem:[#allocation1] ss:$4 sm:$0xff] %v342_v24 }
 0x463   :  { %v393_v25 = vld.sshfl [vmem:[#allocation1] sm:$0xff pattern:$0x73625140] }
 0x464   :  { %399 = vst [vmem:[#allocation1] ss:$4 sm:$0xff] %v336_v20  ;;  %394 = vrot.lane.b32.xlu1 %v393_v25, %s1864_s1 }
 0x46b   :  { %v400_v29 = vld.sshfl [vmem:[#allocation1] sm:$0xff pattern:$0x73625140] }
 0x46c   :  { %411 = vst [vmem:[#allocation1] ss:$4 sm:$0xff] %v383_v28  ;;  %401 = vrot.lane.b32.xlu1 %v400_v29, %s1866_s0 }
 0x473   :  { %v412_v31 = vld.sshfl [vmem:[#allocation1] sm:$0xff pattern:$0x73625140] }
 0x474   :  { %418 = vst [vmem:[#allocation1] ss:$4 sm:$0xff] %v377_v13  ;;  %413 = vrot.lane.b32.xlu0 %v412_v31, %s1864_s1  ;;  %v579_v31 = vsel %vm577_vm6, 1, %v1865_v49 }
 0x47b   :  { %v419_v32 = vld.sshfl [vmem:[#allocation1] sm:$0xff pattern:$0x73625140] }
 0x47c   :  { %424 = vst [vmem:[#allocation1] ss:$4 sm:$0xff] %v342_v24  ;;  %420 = vrot.lane.b32.xlu0 %v419_v32, %s1866_s0 }
 0x483   :  { %v2045_v33 = vld.sshfl [vmem:[#allocation1] sm:$0xff pattern:$0x73625140] }
 0x484   :  { %432 = vst [vmem:[#allocation1] ss:$4 sm:$0xff] %v383_v28 }
 0x4d6   :  { %v395_v35 = vpop.permute.xlu1 %394 }
 0x4d7   :  { %v2053_v36 = vsel %vm390_vm8, %v395_v35, %v1994_v14 }
 0x4d8   :  { %1559 = vmatmul.msk.f32.vlgmr.msrb.gmra.mxu0 %vm80_vm11, %v2053_v36 }
 0x4d9   :  { %1201 = vmatpush.msrb.mxu0 %v1911_v0 }
 0x4db   :  { %1202 = vmatpush.msrb.mxu0 %v1913_v1 }
 0x4dd   :  { %1203 = vmatpush.msrb.mxu0 %v1921_v4 }
 0x4de   :  { %v402_v44 = vpop.permute.xlu1 %401 }
 0x4df   :  { %1204 = vmatpush.msrb.mxu0 %v1929_v6  ;;  %v2079_v47 = vsel %vm390_vm8, %v402_v44, %v2022_v26 }
 0x4e6   :  { %v414_v38 = vpop.permute.xlu0 %413 }
 0x4e7   :  { %v2067_v14 = vsel %vm409_vm9, %v414_v38, %v2009_v17  ;;  %v443_v17 = vld [vmem:[#allocation2 + $0x14] sm:$0xf] }
 0x4e8   :  { %1560 = vmatmul.msk.f32.vlgmr.msrb.gmra.mxu1 %vm80_vm11, %v2067_v14  ;;  %v492_v43 = vrot.slane %v443_v17, 2 }
 0x4e9   :  { %1225 = vmatpush.msrb.mxu1 %v1916_v2 }
 0x4eb   :  { %1226 = vmatpush.msrb.mxu1 %v1918_v3 }
 0x4ed   :  { %1227 = vmatpush.msrb.mxu1 %v1926_v5 }
 0x4ee   :  { %v421_v51 = vpop.permute.xlu0 %420 }
 0x4ef   :  { %1228 = vmatpush.msrb.mxu1 %v1934_v7  ;;  %v2087_v52 = vsel %vm409_vm9, %v421_v51, %v2029_v30  ;;  %v2099_v51 = vld.sshfl [vmem:[#allocation1] sm:$0xff pattern:$0x73625140] }
 0x555   :  { %v464_v40 = vpop.f32.mrf.mxu0 }
 0x556   :  { %v467_v41 = vadd.f32 %v464_v40, %v441_v39 }
 0x558   :  { %1632 = vtanh.f32 %v467_v41  ;;  %v1561_v53 = vmul.f32 -1.442695, %v467_v41 }
 0x55e   :  { %v1633_v42 = vpop.eup %1632 }
 0x55f   :  { %521 = vrot.lane.b32.xlu2 %v1633_v42, %s1860_s30 }
 0x565   :  { %v488_v45 = vpop.f32.mrf.mxu1 }
 0x566   :  { %v494_v46 = vadd.f32 %v492_v43, %v488_v45  ;;  %v598_v45 = vsel %vm578_vm7, 1, %v1865_v49  ;;  %vm770_vm7 = vcmp.gt.s32.totalorder %v1974_v48, 3 }
 0x567   :  { %516 = vrot.lane.b32.xlu2 %v2079_v47, %s1864_s1 }
 0x568   :  { %1634 = vtanh.f32 %v494_v46  ;;  %v1562_v61 = vmul.f32 -1.442695, %v494_v46 }
 0x569   :  { %1636 = vpow2.f32 %v1561_v53 }
 0x56e   :  { %v1635_v50 = vpop.eup %1634 }
 0x56f   :  { %562 = vrot.lane.b32.xlu1 %v1635_v50, %s1860_s30  ;;  %v1637_v26 = vpop.eup %1636 }
 0x570   :  { %v498_v54 = vadd.f32 1.0, %v1637_v26 }
 0x572   :  { %1638 = vrcp.f32 %v498_v54  ;;  %v510_v60 = vand.u32 2147483648, %v498_v54  ;;  %vm504_vm15 = vweird.f32 %v498_v54  ;;  %v508_v62 = vand.u32 2147483647, %v498_v54 }
 0x573   :  { %1640 = vpow2.f32 %v1562_v61 }
 0x574   :  { %v511_v63 = vor.u32 1.1754944e-38, %v510_v60  ;;  %vm509_vm1 = vcmp.eq.f32.partialorder %v508_v62, 8.507059e+37 }
 0x577   :  { %557 = vrot.lane.b32.xlu1 %v2087_v52, %s1864_s1 }
 0x578   :  { %v1639_v55 = vpop.eup %1638 }
 0x579   :  { %v500_v56 = vmul.f32 %v1639_v55, %v498_v54  ;;  %vm505_vm14 = vweird.f32 %v1639_v55  ;;  %v1641_v11 = vpop.eup %1640 }
 0x57a   :  { %vm506_vm0 = vmor %vm504_vm15, %vm505_vm14  ;;  %v539_v13 = vadd.f32 1.0, %v1641_v11 }
 0x57b   :  { %v501_v57 = vsub.f32 1.0, %v500_v56 }
 0x57c   :  { %1642 = vrcp.f32 %v539_v13  ;;  %v551_v22 = vand.u32 2147483648, %v539_v13  ;;  %vm545_vm3 = vweird.f32 %v539_v13  ;;  %v549_v23 = vand.u32 2147483647, %v539_v13 }
 0x57d   :  { %v502_v58 = vmul.f32 %v1639_v55, %v501_v57 }
 0x57e   :  { %v552_v25 = vor.u32 1.1754944e-38, %v551_v22  ;;  %vm550_vm5 = vcmp.eq.f32.partialorder %v549_v23, 8.507059e+37 }
 0x57f   :  { %v503_v59 = vadd.f32 %v1639_v55, %v502_v58 }
 0x581   :  { %v507_v30 = vsel %vm506_vm0, %v1639_v55, %v503_v59 }
 0x582   :  { %v512_v9 = vsel %vm509_vm1, %v511_v63, %v507_v30  ;;  %v1643_v16 = vpop.eup %1642 }
 0x583   :  { %v541_v18 = vmul.f32 %v1643_v16, %v539_v13  ;;  %vm546_vm2 = vweird.f32 %v1643_v16 }
 0x584   :  { %vm547_vm4 = vmor %vm545_vm3, %vm546_vm2 }
 0x585   :  { %v542_v19 = vsub.f32 1.0, %v541_v18 }
 0x587   :  { %v543_v20 = vmul.f32 %v1643_v16, %v542_v19 }
 0x589   :  { %v544_v21 = vadd.f32 %v1643_v16, %v543_v20 }
 0x58b   :  { %v548_v24 = vsel %vm547_vm4, %v1643_v16, %v544_v21 }
 0x58c   :  { %v553_v28 = vsel %vm550_vm5, %v552_v25, %v548_v24 }
 0x5b9   :  { %v522_v8 = vpop.permute.xlu2 %521 }
 0x5ba   :  { %v524_v10 = vmul.f32 %v522_v8, %v512_v9 }
 0x5bc   :  { %526 = vrot.lane.b32.xlu0 %v524_v10, %s1864_s1 }
 0x5c1   :  { %v517_v32 = vpop.permute.xlu2 %516 }
 0x5c2   :  { %v519_v35 = vmul.f32 %v517_v32, %v512_v9 }
 0x5e1   :  { %v563_v27 = vpop.permute.xlu1 %562 }
 0x5e2   :  { %v565_v29 = vmul.f32 %v563_v27, %v553_v28 }
 0x5e4   :  { %567 = vrot.lane.b32.xlu2 %v565_v29, %s1864_s1 }
 0x5e9   :  { %v558_v41 = vpop.permute.xlu1 %557 }
 0x5ea   :  { %v560_v42 = vmul.f32 %v558_v41, %v553_v28 }
 0x5ec   :  { %581 = vperm.xlu2 %1598, %v579_v31  }
 0x62e   :  { %v527_v38 = vpop.permute.xlu0 %526 }
 0x62f   :  { %v529_v39 = vadd.f32 %v527_v38, %v519_v35 }
 0x631   :  { %1644 = vtanh.f32 %v529_v39 }
 0x637   :  { %v1645_v40 = vpop.eup %1644 }
 0x638   :  { %532 = vrot.lane.b32.xlu0 %v1645_v40, %s1860_s30 }
 0x63e   :  { %v568_v17 = vpop.permute.xlu2 %567 }
 0x63f   :  { %v570_v43 = vadd.f32 %v568_v17, %v560_v42 }
 0x641   :  { %1646 = vtanh.f32 %v570_v43 }
 0x646   :  { %v2107_v59 = vpop.permute.xlu2 %581 }
 0x647   :  { %v1647_v44 = vpop.eup %1646  ;;  %vm583_vm15 = vcmp.eq.s32.totalorder %v2107_v59, 1 }
 0x648   :  { %573 = vrot.lane.b32.xlu1 %v1647_v44, %s1860_s30 }
 0x650   :  { %600 = vperm.xlu1 %1599, %v598_v45  }
 0x6aa   :  { %v533_v46 = vpop.permute.xlu0 %532 }
 0x6ab   :  { %v535_v50 = vmul.f32 %v533_v46, %v512_v9 }
 0x6ad   :  { %585 = vst [vmem:[#allocation1] ss:$4 sm:$0xff] %v535_v50 }
 0x6b4   :  { %v586_v53 = vld.sshfl [vmem:[#allocation1] sm:$0xff pattern:$0x73625140] }
 0x6b5   :  { %592 = vst [vmem:[#allocation1] ss:$4 sm:$0xff] %v529_v39  ;;  %587 = vrot.lane.b32.xlu0 %v586_v53, %s1864_s1 }
 0x6ba   :  { %v574_v26 = vpop.permute.xlu1 %573 }
 0x6bb   :  { %v576_v54 = vmul.f32 %v574_v26, %v553_v28 }
 0x6bc   :  { %v593_v55 = vld.sshfl [vmem:[#allocation1] sm:$0xff pattern:$0x73625140] }
 0x6bd   :  { %604 = vst [vmem:[#allocation1] ss:$4 sm:$0xff] %v576_v54  ;;  %594 = vrot.lane.b32.xlu0 %v593_v55, %s1866_s0 }
 0x6c2   :  { %v2109_v60 = vpop.permute.xlu1 %600 }
 0x6c3   :  { %vm602_vm14 = vcmp.eq.s32.totalorder %v2109_v60, 1 }
 0x6c4   :  { %v605_v56 = vld.sshfl [vmem:[#allocation1] sm:$0xff pattern:$0x73625140] }
 0x6c5   :  { %611 = vst [vmem:[#allocation1] ss:$4 sm:$0xff] %v570_v43  ;;  %606 = vrot.lane.b32.xlu2 %v605_v56, %s1864_s1 }
 0x6cc   :  { %v612_v57 = vld.sshfl [vmem:[#allocation1] sm:$0xff pattern:$0x73625140] }
 0x6cd   :  { %617 = vst [vmem:[#allocation1] ss:$4 sm:$0xff] %v535_v50  ;;  %613 = vrot.lane.b32.xlu2 %v612_v57, %s1866_s0  ;;  %v772_v50 = vsel %vm770_vm7, 1, %v1865_v49 }
 0x6d4   :  { %v2105_v58 = vld.sshfl [vmem:[#allocation1] sm:$0xff pattern:$0x73625140] }
 0x6d5   :  { %625 = vst [vmem:[#allocation1] ss:$4 sm:$0xff] %v576_v54 }
 0x71f   :  { %v607_v61 = vpop.permute.xlu2 %606 }
 0x720   :  { %v2115_v62 = vsel %vm602_vm14, %v607_v61, %v2067_v14 }
 0x721   :  { %1564 = vmatmul.msk.f32.vlgmr.msrb.gmra.mxu3 %vm80_vm11, %v2115_v62 }
 0x722   :  { %1404 = vmatpush.msrb.mxu3 %v1916_v2  ;;  %v636_v2 = vld [vmem:[#allocation2 + $0x10] sm:$0xf] }
 0x724   :  { %1405 = vmatpush.msrb.mxu3 %v1918_v3  ;;  %v685_v3 = vrot.slane %v636_v2, 2 }
 0x726   :  { %1406 = vmatpush.msrb.mxu3 %v1926_v5 }
 0x727   :  { %v588_v30 = vpop.permute.xlu0 %587  ;;  %v614_v10 = vpop.permute.xlu2 %613 }
 0x728   :  { %v2126_v63 = vsel %vm583_vm15, %v588_v30, %v2053_v36  ;;  %1407 = vmatpush.msrb.mxu3 %v1934_v7  ;;  %v634_v36 = vld [vmem:[#allocation2 + $0xc] sm:$0xf] }
 0x729   :  { %1563 = vmatmul.msk.f32.vlgmr.msrb.gmra.mxu2 %vm80_vm11, %v2126_v63 }
 0x72a   :  { %1380 = vmatpush.msrb.mxu2 %v1911_v0 }
 0x72c   :  { %1381 = vmatpush.msrb.mxu2 %v1913_v1  ;;  %v2139_v1 = vsel %vm602_vm14, %v614_v10, %v2087_v52 }
 0x72e   :  { %1382 = vmatpush.msrb.mxu2 %v1921_v4 }
 0x72f   :  { %v595_v4 = vpop.permute.xlu0 %594 }
 0x730   :  { %1383 = vmatpush.msrb.mxu2 %v1929_v6  ;;  %v2147_v6 = vsel %vm583_vm15, %v595_v4, %v2079_v47 }
 0x7a4   :  { %v681_v5 = vpop.f32.mrf.mxu3 }
 0x7a5   :  { %v687_v14 = vadd.f32 %v685_v3, %v681_v5 }
 0x7a7   :  { %1648 = vtanh.f32 %v687_v14  ;;  %v1566_v11 = vmul.f32 -1.442695, %v687_v14 }
 0x7ac   :  { %v657_v8 = vpop.f32.mrf.mxu2 }
 0x7ad   :  { %v1649_v9 = vpop.eup %1648  ;;  %v660_v7 = vadd.f32 %v657_v8, %v634_v36 }
 0x7ae   :  { %755 = vrot.lane.b32.xlu0 %v1649_v9, %s1860_s30  ;;  %v2159_v9 = vld.sshfl [vmem:[#allocation1] sm:$0xff pattern:$0x73625140] }
 0x7af   :  { %1650 = vtanh.f32 %v660_v7  ;;  %v1565_v13 = vmul.f32 -1.442695, %v660_v7 }
 0x7b0   :  { %1652 = vpow2.f32 %v1566_v11 }
 0x7b1   :  { %1654 = vpow2.f32 %v1565_v13 }
 0x7b5   :  { %v1651_v0 = vpop.eup %1650 }
 0x7b6   :  { %714 = vrot.lane.b32.xlu1 %v1651_v0, %s1860_s30  ;;  %750 = vrot.lane.b32.xlu0 %v2139_v1, %s1864_s1  ;;  %v1653_v16 = vpop.eup %1652 }
 0x7b7   :  { %v732_v52 = vadd.f32 1.0, %v1653_v16  ;;  %v1655_v18 = vpop.eup %1654 }
 0x7b8   :  { %v691_v19 = vadd.f32 1.0, %v1655_v18 }
 0x7b9   :  { %1656 = vrcp.f32 %v732_v52  ;;  %v744_v28 = vand.u32 2147483648, %v732_v52  ;;  %vm738_vm1 = vweird.f32 %v732_v52  ;;  %v742_v29 = vand.u32 2147483647, %v732_v52 }
 0x7ba   :  { %1658 = vrcp.f32 %v691_v19  ;;  %v703_v42 = vand.u32 2147483648, %v691_v19  ;;  %vm697_vm5 = vweird.f32 %v691_v19  ;;  %v701_v17 = vand.u32 2147483647, %v691_v19 }
 0x7bb   :  { %v745_v35 = vor.u32 1.1754944e-38, %v744_v28  ;;  %vm743_vm3 = vcmp.eq.f32.partialorder %v742_v29, 8.507059e+37 }
 0x7bc   :  { %v704_v44 = vor.u32 1.1754944e-38, %v703_v42 }
 0x7be   :  { %709 = vrot.lane.b32.xlu1 %v2147_v6, %s1864_s1 }
 0x7bf   :  { %v1657_v20 = vpop.eup %1656 }
 0x7c0   :  { %v734_v21 = vmul.f32 %v1657_v20, %v732_v52  ;;  %v1659_v23 = vpop.eup %1658  ;;  %vm739_vm0 = vweird.f32 %v1657_v20 }
 0x7c1   :  { %v693_v47 = vmul.f32 %v1659_v23, %v691_v19  ;;  %vm740_vm2 = vmor %vm738_vm1, %vm739_vm0  ;;  %vm698_vm4 = vweird.f32 %v1659_v23  ;;  %vm702_vm0 = vcmp.eq.f32.partialorder %v701_v17, 8.507059e+37  ;;  %vm771_vm1 = vcmp.gt.s32.totalorder %v1974_v48, 4 }
 0x7c2   :  { %v735_v22 = vsub.f32 1.0, %v734_v21  ;;  %vm699_vm6 = vmor %vm697_vm5, %vm698_vm4  ;;  %v791_v14 = vsel %vm771_vm1, 1, %v1865_v49  ;;  %v826_v21 = vld [vmem:[#allocation2 + $0x10] sm:$0xf] }
 0x7c3   :  { %v694_v27 = vsub.f32 1.0, %v693_v47 }
 0x7c4   :  { %v736_v24 = vmul.f32 %v1657_v20, %v735_v22 }
 0x7c5   :  { %v695_v32 = vmul.f32 %v1659_v23, %v694_v27 }
 0x7c6   :  { %v737_v25 = vadd.f32 %v1657_v20, %v736_v24 }
 0x7c7   :  { %v696_v41 = vadd.f32 %v1659_v23, %v695_v32 }
 0x7c8   :  { %v741_v31 = vsel %vm740_vm2, %v1657_v20, %v737_v25 }
 0x7c9   :  { %v746_v39 = vsel %vm743_vm3, %v745_v35, %v741_v31  ;;  %v700_v43 = vsel %vm699_vm6, %v1659_v23, %v696_v41 }
 0x7ca   :  { %v705_v46 = vsel %vm702_vm0, %v704_v44, %v700_v43 }
 0x820   :  { %v756_v38 = vpop.permute.xlu0 %755 }
 0x821   :  { %v758_v40 = vmul.f32 %v756_v38, %v746_v39 }
 0x823   :  { %760 = vrot.lane.b32.xlu1 %v758_v40, %s1864_s1 }
 0x828   :  { %v715_v45 = vpop.permute.xlu1 %714  ;;  %v751_v61 = vpop.permute.xlu0 %750 }
 0x829   :  { %v717_v53 = vmul.f32 %v715_v45, %v705_v46  ;;  %v753_v30 = vmul.f32 %v751_v61, %v746_v39 }
 0x82b   :  { %774 = vperm.xlu1 %1599, %v772_v50   ;;  %719 = vrot.lane.b32.xlu2 %v717_v53, %s1864_s1 }
 0x830   :  { %v710_v26 = vpop.permute.xlu1 %709 }
 0x831   :  { %v712_v54 = vmul.f32 %v710_v26, %v705_v46 }
 0x885   :  { %v720_v55 = vpop.permute.xlu2 %719 }
 0x886   :  { %v722_v56 = vadd.f32 %v720_v55, %v712_v54 }
 0x888   :  { %1660 = vtanh.f32 %v722_v56 }
 0x88e   :  { %v1661_v57 = vpop.eup %1660 }
 0x88f   :  { %725 = vrot.lane.b32.xlu2 %v1661_v57, %s1860_s30 }
 0x895   :  { %v761_v2 = vpop.permute.xlu1 %760 }
 0x896   :  { %v763_v3 = vadd.f32 %v761_v2, %v753_v30 }
 0x898   :  { %1662 = vtanh.f32 %v763_v3 }
 0x89d   :  { %v2167_v13 = vpop.permute.xlu1 %774 }
 0x89e   :  { %v1663_v5 = vpop.eup %1662  ;;  %vm776_vm2 = vcmp.eq.s32.totalorder %v2167_v13, 1 }
 0x89f   :  { %766 = vrot.lane.b32.xlu0 %v1663_v5, %s1860_s30 }
 0x8a7   :  { %793 = vperm.xlu0 %1597, %v791_v14  }
 0x8e9   :  { %v726_v36 = vpop.permute.xlu2 %725 }
 0x8ea   :  { %v728_v8 = vmul.f32 %v726_v36, %v705_v46 }
 0x8ec   :  { %778 = vst [vmem:[#allocation1] ss:$4 sm:$0xff] %v728_v8 }
 0x8f3   :  { %v779_v7 = vld.sshfl [vmem:[#allocation1] sm:$0xff pattern:$0x73625140] }
 0x8f4   :  { %780 = vrot.lane.b32.xlu2 %v779_v7, %s1864_s1  ;;  %785 = vst [vmem:[#allocation1] ss:$4 sm:$0xff] %v722_v56 }
 0x8fb   :  { %v786_v10 = vld.sshfl [vmem:[#allocation1] sm:$0xff pattern:$0x73625140] }
 0x8fc   :  { %787 = vrot.lane.b32.xlu2 %v786_v10, %s1866_s0 }
 0x911   :  { %v767_v0 = vpop.permute.xlu0 %766 }
 0x912   :  { %v769_v4 = vmul.f32 %v767_v0, %v746_v39 }
 0x914   :  { %797 = vst [vmem:[#allocation1] ss:$4 sm:$0xff] %v769_v4 }
 0x919   :  { %v2177_v18 = vpop.permute.xlu0 %793 }
 0x91a   :  { %vm795_vm3 = vcmp.eq.s32.totalorder %v2177_v18, 1 }
 0x91b   :  { %v798_v11 = vld.sshfl [vmem:[#allocation1] sm:$0xff pattern:$0x73625140] }
 0x91c   :  { %799 = vrot.lane.b32.xlu1 %v798_v11, %s1864_s1  ;;  %804 = vst [vmem:[#allocation1] ss:$4 sm:$0xff] %v763_v3 }
 0x923   :  { %v805_v48 = vld.sshfl [vmem:[#allocation1] sm:$0xff pattern:$0x73625140] }
 0x924   :  { %806 = vrot.lane.b32.xlu1 %v805_v48, %s1866_s0  ;;  %810 = vst [vmem:[#allocation1] ss:$4 sm:$0xff] %v728_v8 }
 0x92b   :  { %v2165_v49 = vld.sshfl [vmem:[#allocation1] sm:$0xff pattern:$0x73625140] }
 0x92c   :  { %818 = vst [vmem:[#allocation1] ss:$4 sm:$0xff] %v769_v4 }
 0x94e   :  { %v781_v16 = vpop.permute.xlu2 %780 }
 0x94f   :  { %v2173_v52 = vsel %vm776_vm2, %v781_v16, %v2126_v63 }
 0x950   :  { %1567 = vmatmul.msk.f32.vlgmr.msra.gmra.mxu0 %vm80_vm11, %v2173_v52 }
 0x956   :  { %v788_v24 = vpop.permute.xlu2 %787 }
 0x957   :  { %v2191_v47 = vsel %vm776_vm2, %v788_v24, %v2147_v6 }
 0x98e   :  { %v800_v19 = vpop.permute.xlu1 %799 }
 0x98f   :  { %v2183_v20 = vsel %vm795_vm3, %v800_v19, %v2115_v62  ;;  %v827_v62 = vld [vmem:[#allocation2 + $0xc] sm:$0xf] }
 0x990   :  { %1568 = vmatmul.msk.f32.vlgmr.msra.gmra.mxu1 %vm80_vm11, %v2183_v20  ;;  %v876_v25 = vrot.slane %v827_v62, 2 }
 0x996   :  { %v807_v31 = vpop.permute.xlu1 %806 }
 0x997   :  { %v2199_v35 = vsel %vm795_vm3, %v807_v31, %v2139_v1 }
 0x9cd   :  { %v848_v22 = vpop.f32.mrf.mxu0 }
 0x9ce   :  { %v851_v63 = vadd.f32 %v848_v22, %v826_v21 }
 0x9d0   :  { %1664 = vtanh.f32 %v851_v63  ;;  %v1569_v32 = vmul.f32 -1.442695, %v851_v63 }
 0x9d6   :  { %v1665_v23 = vpop.eup %1664 }
 0x9d7   :  { %905 = vrot.lane.b32.xlu0 %v1665_v23, %s1860_s30 }
 0x9df   :  { %900 = vrot.lane.b32.xlu0 %v2191_v47, %s1864_s1 }
 0xa0d   :  { %v872_v27 = vpop.f32.mrf.mxu1 }
 0xa0e   :  { %v878_v28 = vadd.f32 %v876_v25, %v872_v27  ;;  %v2207_v25 = vld.sshfl [vmem:[#allocation1] sm:$0xff pattern:$0x73625140] }
 0xa10   :  { %1666 = vtanh.f32 %v878_v28  ;;  %v1570_v44 = vmul.f32 -1.442695, %v878_v28 }
 0xa11   :  { %1668 = vpow2.f32 %v1569_v32 }
 0xa16   :  { %v1667_v29 = vpop.eup %1666 }
 0xa17   :  { %946 = vrot.lane.b32.xlu2 %v1667_v29, %s1860_s30  ;;  %v1669_v6 = vpop.eup %1668 }
 0xa18   :  { %v882_v38 = vadd.f32 1.0, %v1669_v6 }
 0xa1a   :  { %1670 = vrcp.f32 %v882_v38  ;;  %v894_v43 = vand.u32 2147483648, %v882_v38  ;;  %vm888_vm5 = vweird.f32 %v882_v38  ;;  %v892_v45 = vand.u32 2147483647, %v882_v38 }
 0xa1b   :  { %1672 = vpow2.f32 %v1570_v44 }
 0xa1c   :  { %v895_v46 = vor.u32 1.1754944e-38, %v894_v43  ;;  %vm893_vm7 = vcmp.eq.f32.partialorder %v892_v45, 8.507059e+37 }
 0xa1f   :  { %941 = vrot.lane.b32.xlu2 %v2199_v35, %s1864_s1 }
 0xa20   :  { %v1671_v39 = vpop.eup %1670 }
 0xa21   :  { %v884_v40 = vmul.f32 %v1671_v39, %v882_v38  ;;  %vm889_vm4 = vweird.f32 %v1671_v39  ;;  %v1673_v54 = vpop.eup %1672 }
 0xa22   :  { %vm890_vm6 = vmor %vm888_vm5, %vm889_vm4  ;;  %v923_v55 = vadd.f32 1.0, %v1673_v54 }
 0xa23   :  { %v885_v41 = vsub.f32 1.0, %v884_v40 }
 0xa24   :  { %1674 = vrcp.f32 %v923_v55  ;;  %v935_v3 = vand.u32 2147483648, %v923_v55  ;;  %vm929_vm1 = vweird.f32 %v923_v55  ;;  %v933_v5 = vand.u32 2147483647, %v923_v55 }
 0xa25   :  { %v886_v42 = vmul.f32 %v1671_v39, %v885_v41 }
 0xa26   :  { %v936_v36 = vor.u32 1.1754944e-38, %v935_v3  ;;  %vm934_vm5 = vcmp.eq.f32.partialorder %v933_v5, 8.507059e+37 }
 0xa27   :  { %v887_v17 = vadd.f32 %v1671_v39, %v886_v42 }
 0xa29   :  { %v891_v1 = vsel %vm890_vm6, %v1671_v39, %v887_v17  ;;  %v1005_v17 = vld [vmem:[#allocation2 + $0x14] sm:$0xf] }
 0xa2a   :  { %v896_v53 = vsel %vm893_vm7, %v895_v46, %v891_v1  ;;  %v1675_v56 = vpop.eup %1674 }
 0xa2b   :  { %v925_v57 = vmul.f32 %v1675_v56, %v923_v55  ;;  %vm930_vm0 = vweird.f32 %v1675_v56 }
 0xa2c   :  { %vm931_vm4 = vmor %vm929_vm1, %vm930_vm0 }
 0xa2d   :  { %v926_v61 = vsub.f32 1.0, %v925_v57 }
 0xa2f   :  { %v927_v30 = vmul.f32 %v1675_v56, %v926_v61 }
 0xa31   :  { %v928_v2 = vadd.f32 %v1675_v56, %v927_v30 }
 0xa33   :  { %v932_v14 = vsel %vm931_vm4, %v1675_v56, %v928_v2 }
 0xa34   :  { %v937_v7 = vsel %vm934_vm5, %v936_v36, %v932_v14 }
 0xa49   :  { %v906_v50 = vpop.permute.xlu0 %905 }
 0xa4a   :  { %v908_v26 = vmul.f32 %v906_v50, %v896_v53 }
 0xa4c   :  { %910 = vrot.lane.b32.xlu1 %v908_v26, %s1864_s1 }
 0xa51   :  { %v901_v0 = vpop.permute.xlu0 %900 }
 0xa52   :  { %v903_v4 = vmul.f32 %v901_v0, %v896_v53 }
 0xa71   :  { %v947_v8 = vpop.permute.xlu2 %946 }
 0xa72   :  { %v949_v10 = vmul.f32 %v947_v8, %v937_v7 }
 0xa74   :  { %951 = vrot.lane.b32.xlu0 %v949_v10, %s1864_s1 }
 0xa79   :  { %v942_v19 = vpop.permute.xlu2 %941 }
 0xa7a   :  { %v944_v21 = vmul.f32 %v942_v19, %v937_v7 }
 0xabe   :  { %v911_v11 = vpop.permute.xlu1 %910 }
 0xabf   :  { %v913_v48 = vadd.f32 %v911_v11, %v903_v4 }
 0xac1   :  { %1676 = vtanh.f32 %v913_v48 }
 0xac7   :  { %v1677_v16 = vpop.eup %1676 }
 0xac8   :  { %916 = vrot.lane.b32.xlu1 %v1677_v16, %s1860_s30 }
 0xae6   :  { %v952_v22 = vpop.permute.xlu0 %951 }
 0xae7   :  { %v954_v63 = vadd.f32 %v952_v22, %v944_v21 }
 0xae9   :  { %1678 = vtanh.f32 %v954_v63 }
 0xaef   :  { %v1679_v23 = vpop.eup %1678 }
 0xaf0   :  { %957 = vrot.lane.b32.xlu2 %v1679_v23, %s1860_s30 }
 0xb3a   :  { %v917_v24 = vpop.permute.xlu1 %916 }
 0xb3b   :  { %v919_v62 = vmul.f32 %v917_v24, %v896_v53 }
 0xb3d   :  { %962 = vst [vmem:[#allocation1] ss:$4 sm:$0xff] %v919_v62 }
 0xb44   :  { %v963_v27 = vld.sshfl [vmem:[#allocation1] sm:$0xff pattern:$0x73625140] }
 0xb45   :  { %964 = vrot.lane.b32.xlu0 %v963_v27, %s1864_s1  ;;  %969 = vst [vmem:[#allocation1] ss:$4 sm:$0xff] %v913_v48 }
 0xb4a   :  { %v958_v28 = vpop.permute.xlu2 %957 }
 0xb4b   :  { %v960_v29 = vmul.f32 %v958_v28, %v937_v7 }
 0xb4c   :  { %v970_v31 = vld.sshfl [vmem:[#allocation1] sm:$0xff pattern:$0x73625140] }
 0xb4d   :  { %971 = vrot.lane.b32.xlu2 %v970_v31, %s1866_s0  ;;  %976 = vst [vmem:[#allocation1] ss:$4 sm:$0xff] %v960_v29 }
 0xb54   :  { %v977_v32 = vld.sshfl [vmem:[#allocation1] sm:$0xff pattern:$0x73625140] }
 0xb55   :  { %978 = vrot.lane.b32.xlu1 %v977_v32, %s1864_s1  ;;  %983 = vst [vmem:[#allocation1] ss:$4 sm:$0xff] %v954_v63 }
 0xb5c   :  { %v984_v6 = vld.sshfl [vmem:[#allocation1] sm:$0xff pattern:$0x73625140] }
 0xb5d   :  { %985 = vrot.lane.b32.xlu1 %v984_v6, %s1866_s0  ;;  %989 = vst [vmem:[#allocation1] ss:$4 sm:$0xff] %v919_v62 }
 0xb64   :  { %v2213_v38 = vld.sshfl [vmem:[#allocation1] sm:$0xff pattern:$0x73625140] }
 0xb65   :  { %997 = vst [vmem:[#allocation1] ss:$4 sm:$0xff] %v960_v29 }
 0xba7   :  { %v972_v46 = vpop.permute.xlu2 %971 }
 0xbb7   :  { %v965_v39 = vpop.permute.xlu0 %964 }
 0xbb8   :  { %v2218_v40 = vsel %vm795_vm3, %v965_v39, %v2173_v52  ;;  %v1006_v52 = vld [vmem:[#allocation2 + $0x8] sm:$0xf] }
 0xbb9   :  { %1571 = vmatmul.msk.f32.vlgmr.msra.gmra.mxu2 %vm80_vm11, %v2218_v40  ;;  %v1055_v1 = vrot.slane %v1006_v52, 2 }
 0xbc7   :  { %v979_v41 = vpop.permute.xlu1 %978 }
 0xbc8   :  { %v2225_v42 = vsel %vm776_vm2, %v979_v41, %v2183_v20  ;;  %v2233_v20 = vsel %vm795_vm3, %v972_v46, %v2191_v47 }
 0xbc9   :  { %1572 = vmatmul.msk.f32.vlgmr.msra.gmra.mxu3 %vm80_vm11, %v2225_v42 }
 0xbcf   :  { %v986_v54 = vpop.permute.xlu1 %985 }
 0xbd0   :  { %v2241_v55 = vsel %vm776_vm2, %v986_v54, %v2199_v35 }
 0xc3c   :  { %v1027_v43 = vpop.f32.mrf.mxu2 }
 0xc3d   :  { %v1030_v44 = vadd.f32 %v1027_v43, %v1005_v17 }
 0xc3f   :  { %1680 = vtanh.f32 %v1030_v44  ;;  %v1573_v47 = vmul.f32 -1.442695, %v1030_v44 }
 0xc45   :  { %v1681_v45 = vpop.eup %1680 }
 0xc46   :  { %1084 = vrot.lane.b32.xlu0 %v1681_v45, %s1860_s30 }
 0xc4c   :  { %v1051_v50 = vpop.f32.mrf.mxu3 }
 0xc4d   :  { %v1057_v53 = vadd.f32 %v1055_v1, %v1051_v50 }
 0xc4e   :  { %1079 = vrot.lane.b32.xlu0 %v2233_v20, %s1864_s1 }
 0xc4f   :  { %1682 = vtanh.f32 %v1057_v53  ;;  %v1574_v56 = vmul.f32 -1.442695, %v1057_v53  ;;  %v2249_v53 = vld.sshfl [vmem:[#allocation1] sm:$0xff pattern:$0x73625140] }
 0xc51   :  { %1684 = vpow2.f32 %v1574_v56 }
 0xc52   :  { %1686 = vpow2.f32 %v1573_v47 }
 0xc55   :  { %v1683_v26 = vpop.eup %1682 }
 0xc56   :  { %1125 = vrot.lane.b32.xlu2 %v1683_v26, %s1860_s30 }
 0xc57   :  { %v1685_v57 = vpop.eup %1684 }
 0xc58   :  { %v1102_v61 = vadd.f32 1.0, %v1685_v57  ;;  %v1687_v30 = vpop.eup %1686 }
 0xc59   :  { %v1061_v2 = vadd.f32 1.0, %v1687_v30 }
 0xc5a   :  { %1688 = vrcp.f32 %v1102_v61  ;;  %v1114_v0 = vand.u32 2147483648, %v1102_v61  ;;  %vm1108_vm7 = vweird.f32 %v1102_v61  ;;  %v1112_v4 = vand.u32 2147483647, %v1102_v61 }
 0xc5b   :  { %1690 = vrcp.f32 %v1061_v2  ;;  %v1073_v23 = vand.u32 2147483648, %v1061_v2  ;;  %vm1067_vm5 = vweird.f32 %v1061_v2  ;;  %v1071_v24 = vand.u32 2147483647, %v1061_v2 }
 0xc5c   :  { %v1115_v16 = vor.u32 1.1754944e-38, %v1114_v0  ;;  %vm1113_vm1 = vcmp.eq.f32.partialorder %v1112_v4, 8.507059e+37 }
 0xc5d   :  { %v1074_v27 = vor.u32 1.1754944e-38, %v1073_v23  ;;  %vm1072_vm13 = vcmp.eq.f32.partialorder %v1071_v24, 8.507059e+37 }
 0xc5e   :  { %1120 = vrot.lane.b32.xlu2 %v2241_v55, %s1864_s1 }
 0xc60   :  { %v1689_v3 = vpop.eup %1688 }
 0xc61   :  { %v1104_v5 = vmul.f32 %v1689_v3, %v1102_v61  ;;  %v1691_v36 = vpop.eup %1690  ;;  %vm1109_vm6 = vweird.f32 %v1689_v3 }
 0xc62   :  { %v1063_v35 = vmul.f32 %v1691_v36, %v1061_v2  ;;  %vm1110_vm0 = vmor %vm1108_vm7, %vm1109_vm6  ;;  %vm1068_vm4 = vweird.f32 %v1691_v36 }
 0xc63   :  { %v1105_v14 = vsub.f32 1.0, %v1104_v5  ;;  %vm1069_vm12 = vmor %vm1067_vm5, %vm1068_vm4 }
 0xc64   :  { %v1064_v10 = vsub.f32 1.0, %v1063_v35 }
 0xc65   :  { %v1106_v8 = vmul.f32 %v1689_v3, %v1105_v14 }
 0xc66   :  { %v1065_v48 = vmul.f32 %v1691_v36, %v1064_v10 }
 0xc67   :  { %v1107_v7 = vadd.f32 %v1689_v3, %v1106_v8 }
 0xc68   :  { %v1066_v63 = vadd.f32 %v1691_v36, %v1065_v48 }
 0xc69   :  { %v1111_v11 = vsel %vm1110_vm0, %v1689_v3, %v1107_v7 }
 0xc6a   :  { %v1116_v21 = vsel %vm1113_vm1, %v1115_v16, %v1111_v11  ;;  %v1070_v62 = vsel %vm1069_vm12, %v1691_v36, %v1066_v63  ;;  %v1184_v36 = vld [vmem:[#allocation2 + $0x18] sm:$0xf] }
 0xc6b   :  { %v1075_v29 = vsel %vm1072_vm13, %v1074_v27, %v1070_v62 }
 0xcb0   :  { %v1126_v19 = vpop.permute.xlu2 %1125 }
 0xcb1   :  { %v1128_v22 = vmul.f32 %v1126_v19, %v1116_v21 }
 0xcb3   :  { %1130 = vrot.lane.b32.xlu0 %v1128_v22, %s1864_s1 }
 0xcb8   :  { %v1085_v28 = vpop.permute.xlu0 %1084  ;;  %v1121_v6 = vpop.permute.xlu2 %1120 }
 0xcb9   :  { %v1087_v31 = vmul.f32 %v1085_v28, %v1075_v29  ;;  %v1123_v39 = vmul.f32 %v1121_v6, %v1116_v21 }
 0xcbb   :  { %1089 = vrot.lane.b32.xlu1 %v1087_v31, %s1864_s1 }
 0xcc0   :  { %v1080_v32 = vpop.permute.xlu0 %1079 }
 0xcc1   :  { %v1082_v43 = vmul.f32 %v1080_v32, %v1075_v29 }
 0xd25   :  { %v1131_v41 = vpop.permute.xlu0 %1130 }
 0xd26   :  { %v1133_v17 = vadd.f32 %v1131_v41, %v1123_v39 }
 0xd28   :  { %1692 = vtanh.f32 %v1133_v17 }
 0xd2d   :  { %v1090_v44 = vpop.permute.xlu1 %1089 }
 0xd2e   :  { %v1693_v45 = vpop.eup %1692  ;;  %v1092_v52 = vadd.f32 %v1090_v44, %v1082_v43 }
 0xd2f   :  { %1136 = vrot.lane.b32.xlu2 %v1693_v45, %s1860_s30 }
 0xd30   :  { %1694 = vtanh.f32 %v1092_v52 }
 0xd36   :  { %v1695_v1 = vpop.eup %1694 }
 0xd37   :  { %1095 = vrot.lane.b32.xlu1 %v1695_v1, %s1860_s30 }
 0xd89   :  { %v1137_v54 = vpop.permute.xlu2 %1136 }
 0xd8a   :  { %v1139_v56 = vmul.f32 %v1137_v54, %v1116_v21 }
 0xda9   :  { %v1096_v46 = vpop.permute.xlu1 %1095 }
 0xdaa   :  { %v1098_v50 = vmul.f32 %v1096_v46, %v1075_v29 }
 0xdac   :  { %1141 = vst [vmem:[#allocation1] ss:$4 sm:$0xff] %v1098_v50 }
 0xdb3   :  { %v1142_v26 = vld.sshfl [vmem:[#allocation1] sm:$0xff pattern:$0x73625140] }
 0xdb4   :  { %1143 = vrot.lane.b32.xlu0 %v1142_v26, %s1864_s1  ;;  %1148 = vst [vmem:[#allocation1] ss:$4 sm:$0xff] %v1092_v52 }
 0xdbb   :  { %v1149_v47 = vld.sshfl [vmem:[#allocation1] sm:$0xff pattern:$0x73625140] }
 0xdbc   :  { %1150 = vrot.lane.b32.xlu2 %v1149_v47, %s1866_s0  ;;  %1155 = vst [vmem:[#allocation1] ss:$4 sm:$0xff] %v1139_v56 }
 0xdc3   :  { %v1156_v57 = vld.sshfl [vmem:[#allocation1] sm:$0xff pattern:$0x73625140] }
 0xdc4   :  { %1157 = vrot.lane.b32.xlu1 %v1156_v57, %s1864_s1  ;;  %1162 = vst [vmem:[#allocation1] ss:$4 sm:$0xff] %v1133_v17 }
 0xdcb   :  { %v1163_v61 = vld.sshfl [vmem:[#allocation1] sm:$0xff pattern:$0x73625140] }
 0xdcc   :  { %1164 = vrot.lane.b32.xlu1 %v1163_v61, %s1866_s0  ;;  %1168 = vst [vmem:[#allocation1] ss:$4 sm:$0xff] %v1098_v50 }
 0xdd3   :  { %v2255_v30 = vld.sshfl [vmem:[#allocation1] sm:$0xff pattern:$0x73625140] }
 0xdd4   :  { %1176 = vst [vmem:[#allocation1] ss:$4 sm:$0xff] %v1139_v56 }
 0xe16   :  { %v1151_v0 = vpop.permute.xlu2 %1150 }
 0xe26   :  { %v1144_v2 = vpop.permute.xlu0 %1143 }
 0xe27   :  { %v2260_v3 = vsel %vm602_vm14, %v1144_v2, %v2218_v40  ;;  %v1185_v40 = vld [vmem:[#allocation2 + $0x4] sm:$0xf] }
 0xe28   :  { %1575 = vmatmul.msk.f32.vlgmr.msrb.gmra.mxu0 %vm80_vm11, %v2260_v3  ;;  %v1234_v10 = vrot.slane %v1185_v40, 2 }
 0xe36   :  { %v1158_v5 = vpop.permute.xlu1 %1157 }
 0xe37   :  { %v2267_v14 = vsel %vm583_vm15, %v1158_v5, %v2225_v42  ;;  %v2275_v42 = vsel %vm602_vm14, %v1151_v0, %v2233_v20 }
 0xe38   :  { %1576 = vmatmul.msk.f32.vlgmr.msrb.gmra.mxu1 %vm80_vm11, %v2267_v14 }
 0xe3e   :  { %v1165_v16 = vpop.permute.xlu1 %1164 }
 0xe3f   :  { %v2283_v19 = vsel %vm583_vm15, %v1165_v16, %v2241_v55  ;;  %v2291_v16 = vld.sshfl [vmem:[#allocation1] sm:$0xff pattern:$0x73625140] }
 0xea5   :  { %v1206_v8 = vpop.f32.mrf.mxu0 }
 0xea6   :  { %v1209_v35 = vadd.f32 %v1206_v8, %v1184_v36 }
 0xea8   :  { %1696 = vtanh.f32 %v1209_v35  ;;  %v1577_v20 = vmul.f32 -1.442695, %v1209_v35 }
 0xeae   :  { %v1697_v7 = vpop.eup %1696 }
 0xeaf   :  { %1263 = vrot.lane.b32.xlu0 %v1697_v7, %s1860_s30 }
 0xeb5   :  { %v1230_v4 = vpop.f32.mrf.mxu1 }
 0xeb6   :  { %v1236_v11 = vadd.f32 %v1234_v10, %v1230_v4 }
 0xeb7   :  { %1258 = vrot.lane.b32.xlu0 %v2275_v42, %s1864_s1 }
 0xeb8   :  { %1698 = vtanh.f32 %v1236_v11  ;;  %v1578_v21 = vmul.f32 -1.442695, %v1236_v11 }
 0xeba   :  { %1700 = vpow2.f32 %v1578_v21 }
 0xebb   :  { %1702 = vpow2.f32 %v1577_v20 }
 0xebe   :  { %v1699_v48 = vpop.eup %1698 }
 0xebf   :  { %1304 = vrot.lane.b32.xlu2 %v1699_v48, %s1860_s30 }
 0xec0   :  { %v1701_v22 = vpop.eup %1700 }
 0xec1   :  { %v1281_v63 = vadd.f32 1.0, %v1701_v22  ;;  %v1703_v23 = vpop.eup %1702 }
 0xec2   :  { %v1240_v24 = vadd.f32 1.0, %v1703_v23 }
 0xec3   :  { %1704 = vrcp.f32 %v1281_v63  ;;  %v1293_v39 = vand.u32 2147483648, %v1281_v63  ;;  %vm1287_vm13 = vweird.f32 %v1281_v63  ;;  %v1291_v41 = vand.u32 2147483647, %v1281_v63 }
 0xec4   :  { %1706 = vrcp.f32 %v1240_v24  ;;  %v1252_v50 = vand.u32 2147483648, %v1240_v24  ;;  %vm1246_vm1 = vweird.f32 %v1240_v24  ;;  %v1250_v26 = vand.u32 2147483647, %v1240_v24 }
 0xec5   :  { %v1294_v44 = vor.u32 1.1754944e-38, %v1293_v39  ;;  %vm1292_vm7 = vcmp.eq.f32.partialorder %v1291_v41, 8.507059e+37  ;;  %v1364_v41 = vld [vmem:[#allocation2] sm:$0xf] }
 0xec6   :  { %v1253_v56 = vor.u32 1.1754944e-38, %v1252_v50  ;;  %vm1251_vm5 = vcmp.eq.f32.partialorder %v1250_v26, 8.507059e+37 }
 0xec7   :  { %1299 = vrot.lane.b32.xlu2 %v2283_v19, %s1864_s1 }
 0xec9   :  { %v1705_v62 = vpop.eup %1704 }
 0xeca   :  { %v1283_v27 = vmul.f32 %v1705_v62, %v1281_v63  ;;  %v1707_v29 = vpop.eup %1706  ;;  %vm1288_vm12 = vweird.f32 %v1705_v62 }
 0xecb   :  { %v1242_v55 = vmul.f32 %v1707_v29, %v1240_v24  ;;  %vm1289_vm6 = vmor %vm1287_vm13, %vm1288_vm12  ;;  %vm1247_vm0 = vweird.f32 %v1707_v29 }
 0xecc   :  { %v1284_v28 = vsub.f32 1.0, %v1283_v27  ;;  %vm1248_vm4 = vmor %vm1246_vm1, %vm1247_vm0 }
 0xecd   :  { %v1243_v6 = vsub.f32 1.0, %v1242_v55  ;;  %v1363_v55 = vld [vmem:[#allocation2 + $0x1c] sm:$0xf] }
 0xece   :  { %v1285_v31 = vmul.f32 %v1705_v62, %v1284_v28 }
 0xecf   :  { %v1244_v43 = vmul.f32 %v1707_v29, %v1243_v6 }
 0xed0   :  { %v1286_v32 = vadd.f32 %v1705_v62, %v1285_v31 }
 0xed1   :  { %v1245_v46 = vadd.f32 %v1707_v29, %v1244_v43 }
 0xed2   :  { %v1290_v17 = vsel %vm1289_vm6, %v1705_v62, %v1286_v32 }
 0xed3   :  { %v1295_v52 = vsel %vm1292_vm7, %v1294_v44, %v1290_v17  ;;  %v1249_v54 = vsel %vm1248_vm4, %v1707_v29, %v1245_v46  ;;  %v1413_v17 = vrot.slane %v1364_v41, 2 }
 0xed4   :  { %v1254_v57 = vsel %vm1251_vm5, %v1253_v56, %v1249_v54 }
 0xf19   :  { %v1305_v45 = vpop.permute.xlu2 %1304 }
 0xf1a   :  { %v1307_v1 = vmul.f32 %v1305_v45, %v1295_v52 }
 0xf1c   :  { %1309 = vrot.lane.b32.xlu0 %v1307_v1, %s1864_s1 }
 0xf21   :  { %v1264_v47 = vpop.permute.xlu0 %1263  ;;  %v1300_v5 = vpop.permute.xlu2 %1299 }
 0xf22   :  { %v1266_v61 = vmul.f32 %v1264_v47, %v1254_v57  ;;  %v1302_v36 = vmul.f32 %v1300_v5, %v1295_v52 }
 0xf24   :  { %1268 = vrot.lane.b32.xlu1 %v1266_v61, %s1864_s1 }
 0xf29   :  { %v1259_v2 = vpop.permute.xlu0 %1258 }
 0xf2a   :  { %v1261_v7 = vmul.f32 %v1259_v2, %v1254_v57 }
 0xf8e   :  { %v1310_v8 = vpop.permute.xlu0 %1309 }
 0xf8f   :  { %v1312_v35 = vadd.f32 %v1310_v8, %v1302_v36 }
 0xf91   :  { %1708 = vtanh.f32 %v1312_v35 }
 0xf96   :  { %v1269_v40 = vpop.permute.xlu1 %1268 }
 0xf97   :  { %v1709_v10 = vpop.eup %1708  ;;  %v1271_v0 = vadd.f32 %v1269_v40, %v1261_v7 }
 0xf98   :  { %1315 = vrot.lane.b32.xlu2 %v1709_v10, %s1860_s30 }
 0xf99   :  { %1710 = vtanh.f32 %v1271_v0 }
 0xf9f   :  { %v1711_v4 = vpop.eup %1710 }
 0xfa0   :  { %1274 = vrot.lane.b32.xlu1 %v1711_v4, %s1860_s30 }
 0xff2   :  { %v1316_v20 = vpop.permute.xlu2 %1315 }
 0xff3   :  { %v1318_v22 = vmul.f32 %v1316_v20, %v1295_v52 }
0x1012   :  { %v1275_v11 = vpop.permute.xlu1 %1274 }
0x1013   :  { %v1277_v48 = vmul.f32 %v1275_v11, %v1254_v57 }
0x1015   :  { %1320 = vst [vmem:[#allocation1] ss:$4 sm:$0xff] %v1277_v48 }
0x101c   :  { %v1321_v21 = vld.sshfl [vmem:[#allocation1] sm:$0xff pattern:$0x73625140] }
0x101d   :  { %1322 = vrot.lane.b32.xlu0 %v1321_v21, %s1864_s1  ;;  %1327 = vst [vmem:[#allocation1] ss:$4 sm:$0xff] %v1271_v0 }
0x1024   :  { %v1328_v63 = vld.sshfl [vmem:[#allocation1] sm:$0xff pattern:$0x73625140] }
0x1025   :  { %1329 = vrot.lane.b32.xlu2 %v1328_v63, %s1866_s0  ;;  %1334 = vst [vmem:[#allocation1] ss:$4 sm:$0xff] %v1318_v22 }
0x102c   :  { %v1335_v23 = vld.sshfl [vmem:[#allocation1] sm:$0xff pattern:$0x73625140] }
0x102d   :  { %1336 = vrot.lane.b32.xlu1 %v1335_v23, %s1864_s1  ;;  %1341 = vst [vmem:[#allocation1] ss:$4 sm:$0xff] %v1312_v35 }
0x1034   :  { %v1342_v24 = vld.sshfl [vmem:[#allocation1] sm:$0xff pattern:$0x73625140] }
0x1035   :  { %1343 = vrot.lane.b32.xlu1 %v1342_v24, %s1866_s0  ;;  %1347 = vst [vmem:[#allocation1] ss:$4 sm:$0xff] %v1277_v48 }
0x103c   :  { %v2297_v62 = vld.sshfl [vmem:[#allocation1] sm:$0xff pattern:$0x73625140] }
0x103d   :  { %1355 = vst [vmem:[#allocation1] ss:$4 sm:$0xff] %v1318_v22 }
0x107f   :  { %v1330_v43 = vpop.permute.xlu2 %1329 }
0x1080   :  { %v1332_v45 = vsel %vm409_vm9, %v1330_v43, %v2275_v42 }
0x108f   :  { %v1323_v27 = vpop.permute.xlu0 %1322 }
0x1090   :  { %v1325_v28 = vsel %vm409_vm9, %v1323_v27, %v2260_v3 }
0x1091   :  { %1579 = vmatmul.msk.f32.vlgmr.msrb.gmra.mxu2 %vm80_vm11, %v1325_v28 }
0x109f   :  { %v1337_v29 = vpop.permute.xlu1 %1336 }
0x10a0   :  { %v1339_v31 = vsel %vm390_vm8, %v1337_v29, %v2267_v14 }
0x10a1   :  { %1580 = vmatmul.msk.f32.vlgmr.msrb.gmra.mxu3 %vm80_vm11, %v1339_v31 }
0x10a7   :  { %v1344_v52 = vpop.permute.xlu1 %1343 }
0x10a8   :  { %v1346_v1 = vsel %vm390_vm8, %v1344_v52, %v2283_v19 }
0x1114   :  { %v1385_v32 = vpop.f32.mrf.mxu2 }
0x1115   :  { %v1388_v6 = vadd.f32 %v1385_v32, %v1363_v55 }
0x1117   :  { %1712 = vtanh.f32 %v1388_v6  ;;  %v1581_v50 = vmul.f32 -1.442695, %v1388_v6 }
0x111d   :  { %v1713_v39 = vpop.eup %1712 }
0x111e   :  { %1442 = vrot.lane.b32.xlu0 %v1713_v39, %s1860_s30 }
0x1124   :  { %v1409_v3 = vpop.f32.mrf.mxu3 }
0x1125   :  { %v1415_v44 = vadd.f32 %v1413_v17, %v1409_v3 }
0x1126   :  { %1437 = vrot.lane.b32.xlu0 %v1332_v45, %s1864_s1 }
0x1127   :  { %1714 = vtanh.f32 %v1415_v44  ;;  %v1582_v46 = vmul.f32 -1.442695, %v1415_v44 }
0x1129   :  { %1716 = vpow2.f32 %v1582_v46 }
0x112a   :  { %1718 = vpow2.f32 %v1581_v50 }
0x112d   :  { %v1715_v14 = vpop.eup %1714 }
0x112e   :  { %1483 = vrot.lane.b32.xlu2 %v1715_v14, %s1860_s30 }
0x112f   :  { %v1717_v26 = vpop.eup %1716 }
0x1130   :  { %v1460_v54 = vadd.f32 1.0, %v1717_v26  ;;  %v1719_v42 = vpop.eup %1718 }
0x1131   :  { %v1419_v56 = vadd.f32 1.0, %v1719_v42 }
0x1132   :  { %1720 = vrcp.f32 %v1460_v54  ;;  %v1472_v35 = vand.u32 2147483648, %v1460_v54  ;;  %vm1466_vm12 = vweird.f32 %v1460_v54  ;;  %v1470_v7 = vand.u32 2147483647, %v1460_v54 }
0x1133   :  { %1722 = vrcp.f32 %v1419_v56  ;;  %v1431_v20 = vand.u32 2147483648, %v1419_v56  ;;  %vm1425_vm0 = vweird.f32 %v1419_v56  ;;  %v1429_v22 = vand.u32 2147483647, %v1419_v56 }
0x1134   :  { %v1473_v0 = vor.u32 1.1754944e-38, %v1472_v35  ;;  %vm1471_vm6 = vcmp.eq.f32.partialorder %v1470_v7, 8.507059e+37 }
0x1135   :  { %v1432_v23 = vor.u32 1.1754944e-38, %v1431_v20  ;;  %vm1430_vm4 = vcmp.eq.f32.partialorder %v1429_v22, 8.507059e+37 }
0x1136   :  { %1478 = vrot.lane.b32.xlu2 %v1346_v1, %s1864_s1 }
0x1138   :  { %v1721_v47 = vpop.eup %1720 }
0x1139   :  { %v1462_v57 = vmul.f32 %v1721_v47, %v1460_v54  ;;  %v1723_v2 = vpop.eup %1722  ;;  %vm1467_vm11 = vweird.f32 %v1721_v47 }
0x113a   :  { %v1421_v36 = vmul.f32 %v1723_v2, %v1419_v56  ;;  %vm1468_vm13 = vmor %vm1466_vm12, %vm1467_vm11  ;;  %vm1426_vm7 = vweird.f32 %v1723_v2 }
0x113b   :  { %v1463_v61 = vsub.f32 1.0, %v1462_v57  ;;  %vm1427_vm1 = vmor %vm1425_vm0, %vm1426_vm7 }
0x113c   :  { %v1422_v19 = vsub.f32 1.0, %v1421_v36 }
0x113d   :  { %v1464_v5 = vmul.f32 %v1721_v47, %v1463_v61 }
0x113e   :  { %v1423_v10 = vmul.f32 %v1723_v2, %v1422_v19 }
0x113f   :  { %v1465_v8 = vadd.f32 %v1721_v47, %v1464_v5 }
0x1140   :  { %v1424_v21 = vadd.f32 %v1723_v2, %v1423_v10 }
0x1141   :  { %v1469_v40 = vsel %vm1468_vm13, %v1721_v47, %v1465_v8 }
0x1142   :  { %v2317_v11 = vsel %vm1471_vm6, %v1473_v0, %v1469_v40  ;;  %v1428_v63 = vsel %vm1427_vm1, %v1723_v2, %v1424_v21 }
0x1143   :  { %v1433_v27 = vsel %vm1430_vm4, %v1432_v23, %v1428_v63 }
0x1188   :  { %v1484_v4 = vpop.permute.xlu2 %1483 }
0x1189   :  { %v1486_v48 = vmul.f32 %v1484_v4, %v2317_v11 }
0x118b   :  { %1488 = vrot.lane.b32.xlu0 %v1486_v48, %s1864_s1 }
0x1190   :  { %v1443_v24 = vpop.permute.xlu0 %1442  ;;  %v1479_v31 = vpop.permute.xlu2 %1478 }
0x1191   :  { %v1445_v28 = vmul.f32 %v1443_v24, %v1433_v27  ;;  %v1481_v55 = vmul.f32 %v1479_v31, %v2317_v11 }
0x1193   :  { %426 = vrot.lane.b32.xlu0 %v2045_v33, %s1864_s1  ;;  %1447 = vrot.lane.b32.xlu1 %v1445_v28, %s1864_s1 }
0x1198   :  { %v1438_v29 = vpop.permute.xlu0 %1437 }
0x1199   :  { %v1440_v39 = vmul.f32 %v1438_v29, %v1433_v27 }
0x119b   :  { %627 = vrot.lane.b32.xlu0 %v2159_v9, %s1864_s1 }
0x11a3   :  { %991 = vrot.lane.b32.xlu0 %v2213_v38, %s1864_s1 }
0x11ab   :  { %1178 = vrot.lane.b32.xlu0 %v2291_v16, %s1864_s1 }
0x11fd   :  { %v1489_v32 = vpop.permute.xlu0 %1488 }
0x11fe   :  { %v1491_v6 = vadd.f32 %v1489_v32, %v1481_v55 }
0x1200   :  { %1724 = vtanh.f32 %v1491_v6 }
0x1205   :  { %v427_v33 = vpop.permute.xlu0 %426  ;;  %v1448_v41 = vpop.permute.xlu1 %1447 }
0x1206   :  { %v1725_v17 = vpop.eup %1724  ;;  %v429_v9 = vsel %vm390_vm8, %v427_v33, 0.0  ;;  %v1450_v43 = vadd.f32 %v1448_v41, %v1440_v39 }
0x1207   :  { %431 = vst.msk [vmem:[#allocation8 + $0x2] sm:$0x3] %vm243_vm10, %v429_v9  ;;  %1494 = vrot.lane.b32.xlu2 %v1725_v17, %s1860_s30 }
0x1208   :  { %1726 = vtanh.f32 %v1450_v43 }
0x120d   :  { %v628_v38 = vpop.permute.xlu0 %627 }
0x120e   :  { %v1727_v16 = vpop.eup %1726  ;;  %v630_v3 = vsel %vm602_vm14, %v628_v38, 0.0 }
0x120f   :  { %632 = vst.msk [vmem:[#allocation9 + $0xa] sm:$0x3] %vm243_vm10, %v630_v3  ;;  %619 = vrot.lane.b32.xlu2 %v2105_v58, %s1864_s1  ;;  %1453 = vrot.lane.b32.xlu1 %v1727_v16, %s1860_s30  ;;  %v1356_v58 = vld.sshfl [vmem:[#allocation1] sm:$0xff pattern:$0x73625140] }
0x1215   :  { %v992_v44 = vpop.permute.xlu0 %991 }
0x1216   :  { %v994_v45 = vsel %vm795_vm3, %v992_v44, 0.0 }
0x1217   :  { %996 = vst.msk [vmem:[#allocation8 + $0x8] sm:$0x3] %vm243_vm10, %v994_v45  ;;  %820 = vrot.lane.b32.xlu2 %v2207_v25, %s1864_s1  ;;  %434 = vrot.lane.b32.xlu1 %v2099_v51, %s1864_s1 }
0x121d   :  { %v1179_v14 = vpop.permute.xlu0 %1178 }
0x121e   :  { %v1181_v52 = vsel %vm583_vm15, %v1179_v14, 0.0 }
0x121f   :  { %1183 = vst.msk [vmem:[#allocation9 + $0x4] sm:$0x3] %vm243_vm10, %v1181_v52  ;;  %1170 = vrot.lane.b32.xlu2 %v2255_v30, %s1864_s1  ;;  %812 = vrot.lane.b32.xlu1 %v2165_v49, %s1864_s1 }
0x1227   :  { %999 = vrot.lane.b32.xlu1 %v2249_v53, %s1864_s1  ;;  %1357 = vrot.lane.b32.xlu2 %v1356_v58, %s1864_s1 }
0x122f   :  { %1349 = vrot.lane.b32.xlu1 %v2297_v62, %s1864_s1 }
0x1261   :  { %v1495_v51 = vpop.permute.xlu2 %1494 }
0x1262   :  { %v1497_v18 = vmul.f32 %v1495_v51, %v2317_v11 }
0x1269   :  { %v620_v25 = vpop.permute.xlu2 %619 }
0x126a   :  { %v622_v1 = vsel %vm583_vm15, %v620_v25, 0.0 }
0x126b   :  { %624 = vst.msk [vmem:[#allocation8 + $0x4] sm:$0x3] %vm243_vm10, %v622_v1 }
0x1271   :  { %v821_v30 = vpop.permute.xlu2 %820 }
0x1272   :  { %v823_v49 = vsel %vm795_vm3, %v821_v30, 0.0 }
0x1273   :  { %825 = vst.msk [vmem:[#allocation9 + $0x8] sm:$0x3] %vm243_vm10, %v823_v49 }
0x1279   :  { %v1171_v46 = vpop.permute.xlu2 %1170 }
0x127a   :  { %v1173_v53 = vsel %vm602_vm14, %v1171_v46, 0.0 }
0x127b   :  { %1175 = vst.msk [vmem:[#allocation8 + $0xa] sm:$0x3] %vm243_vm10, %v1173_v53 }
0x1281   :  { %v1454_v62 = vpop.permute.xlu1 %1453  ;;  %v1358_v50 = vpop.permute.xlu2 %1357 }
0x1282   :  { %v1456_v26 = vmul.f32 %v1454_v62, %v1433_v27  ;;  %v1360_v59 = vsel %vm390_vm8, %v1358_v50, 0.0  ;;  %vm2411_vm8 = vcmp.eq.s32.totalorder %v2004_v15, 1 }
0x1283   :  { %1362 = vst.msk [vmem:[#allocation9 + $0x2] sm:$0x3] %vm243_vm10, %v1360_v59 }
0x1284   :  { %1499 = vst [vmem:[#allocation1] ss:$4 sm:$0xff] %v1456_v26 }
0x1289   :  { %v435_v54 = vpop.permute.xlu1 %434 }
0x128a   :  { %v437_v42 = vsel %vm409_vm9, %v435_v54, 0.0 }
0x128b   :  { %439 = vst.msk [vmem:[#allocation9 + $0xc] sm:$0x3] %vm243_vm10, %v437_v42  ;;  %v1500_v60 = vld.sshfl [vmem:[#allocation1] sm:$0xff pattern:$0x73625140] }
0x128c   :  { %1501 = vrot.lane.b32.xlu0 %v1500_v60, %s1864_s1  ;;  %1508 = vst [vmem:[#allocation1] ss:$4 sm:$0xff] %v1497_v18 }
0x1291   :  { %v813_v56 = vpop.permute.xlu1 %812 }
0x1292   :  { %v815_v34 = vsel %vm776_vm2, %v813_v56, 0.0 }
0x1293   :  { %817 = vst.msk [vmem:[#allocation8 + $0x6] sm:$0x3] %vm243_vm10, %v815_v34  ;;  %v1509_v47 = vld.sshfl [vmem:[#allocation1] sm:$0xff pattern:$0x73625140] }
0x1294   :  { %1510 = vrot.lane.b32.xlu1 %v1509_v47, %s1864_s1 }
0x1299   :  { %v1000_v57 = vpop.permute.xlu1 %999 }
0x129a   :  { %v1002_v61 = vsel %vm776_vm2, %v1000_v57, 0.0 }
0x129b   :  { %1004 = vst.msk [vmem:[#allocation9 + $0x6] sm:$0x3] %vm243_vm10, %v1002_v61 }
0x12a1   :  { %v1350_v2 = vpop.permute.xlu1 %1349 }
0x12a2   :  { %v1352_v5 = vsel %vm409_vm9, %v1350_v2, 0.0  ;;  %vm2412_vm9 = vcmp.eq.s32.totalorder %v1989_v12, 1 }
0x12a3   :  { %1354 = vst.msk [vmem:[#allocation8 + $0xc] sm:$0x3] %vm243_vm10, %v1352_v5 }
0x12fe   :  { %v1502_v36 = vpop.permute.xlu0 %1501 }
0x12ff   :  { %v1504_v13 = vsel %vm2411_vm8, %v1502_v36, 0.0 }
0x1300   :  { %1506 = vst.msk [vmem:[#allocation8 + $0xe] sm:$0x3] %vm243_vm10, %v1504_v13 }
0x1301   :  { %1527 = dma.vmem_to_hbm [thread:$0]  %s1520_s13, 256, %s1522_s16, [#allocation4], %s1864_s1, %s1864_s1, %s1868_s17  }
0x1306   :  { %v1511_v37 = vpop.permute.xlu1 %1510 }
0x1307   :  { %v1513_v8 = vsel %vm2412_vm9, %v1511_v37, 0.0 }
0x1308   :  { %1514 = vst.msk [vmem:[#allocation9] sm:$0x3] %vm243_vm10, %v1513_v8 }
0x1309   :  { %1540 = dma.vmem_to_hbm [thread:$0]  %s1533_s19, 256, %s1535_s22, [#allocation10], %s1864_s1, %s1864_s1, %s1868_s17  }
0x130a   :  { %1852 = dma.done.wait [#allocation4], 256  }
0x130b   :  { %1853 = vsyncadd [#allocation4], 4294967040 }
0x130c   :  { %1854 = dma.done.wait [#allocation10], 256  }
0x130d   :  { %1855 = vsyncadd [#allocation10], 4294967040 }
0x130e   :  { %1549 = vsyncpa [#allocation3], 1 }
0x130f   :  { %1550 = vsyncpa [#allocation6], 1 }
0x1310   :  { %1551 = vsyncpa [#allocation4], 1 }
0x1311   :  { %1552 = vsyncpa [#allocation10], 1 }

</bundles_post_ra>
